<compile_context>
chip_gen: v6e
topology: v6e:2x2x1
jax: 0.10.0
libtpu: 0.0.40
codegen_flags: <defaults>
</compile_context>

<pallas_src>
import functools
import math

import jax
import jax.numpy as jnp
import numpy as np
from jax.experimental import pallas as pl
from jax.experimental.pallas import tpu as pltpu

# ---------------- hyperparameters (small, consistent with the module) ----------------
SEQ = 8            # sequence length for the self-attention encoders
MID = 1            # PyTorch dim 1 (must be 1: the module squeeze(1)'s it)
D = 32             # visual_dim == physiological_dim (required by the module's math)
NUM_HEADS = 4
DH = D // NUM_HEADS
HIDDEN = 64        # feed-forward hidden_dim
NUM_CLASSES = 2
LN_EPS = 1e-5      # PyTorch nn.LayerNorm default
LANES = 128        # TPU lane width; param/output slabs are lane-dense
NENC = 2           # two encoders (visual, physiological) batched together


# ---------------- in-kernel math helpers (traced inside the Pallas kernel) ----------------
def _layernorm(x, gamma, beta):
    mean = jnp.mean(x, axis=-1, keepdims=True)
    var = jnp.mean((x - mean) ** 2, axis=-1, keepdims=True)  # biased, like PyTorch
    return (x - mean) * jax.lax.rsqrt(var + LN_EPS) * gamma + beta


def _softmax_lastdim(s):
    m = jnp.max(s, axis=-1, keepdims=True)
    e = jnp.exp(s - m)
    return e / jnp.sum(e, axis=-1, keepdims=True)


# ---------------- the fused Pallas kernel (closure over static slab offsets) ----------------
def _make_kernel(offsets):
    def load(p_ref, name):
        r0, nr, nc = offsets[name]          # static python ints -> zero-cost view
        return p_ref[r0:r0 + nr, :nc]

    def kernel(x_ref, p_ref, out_ref):
        x = x_ref[...]                                            # (2, S, D): [visual, phys]

        # ---- both encoders, batched over g = encoder*head (self-attention, mid dim == 1) ----
        G = NENC * NUM_HEADS
        in_w = load(p_ref, 'enc_attn_in_w').reshape(G, D, 3 * DH)
        in_b = load(p_ref, 'enc_attn_in_b').reshape(G, SEQ, 3 * DH)
        out_w = load(p_ref, 'enc_attn_out_w').reshape(G, DH, D)
        out_b = load(p_ref, 'enc_attn_out_b').reshape(NENC, SEQ, D)

        # replicate each encoder's activations across its heads (encoder-major layout)
        xg = jnp.concatenate(
            [jnp.broadcast_to(x[e:e + 1], (NUM_HEADS, SEQ, D)) for e in range(NENC)], axis=0)

        scale = 1.0 / math.sqrt(DH)
        qkv = jnp.einsum('gsd,gdf->gsf', xg, in_w,
                         preferred_element_type=jnp.float32) + in_b       # (G,S,3DH)
        q = qkv[:, :, :DH] * scale
        k = qkv[:, :, DH:2 * DH]
        v = qkv[:, :, 2 * DH:]
        s = jnp.einsum('gqe,gke->gqk', q, k, preferred_element_type=jnp.float32)   # (G,S,S)
        p_attn = _softmax_lastdim(s)
        a = jnp.einsum('gqk,gke->gqe', p_attn, v, preferred_element_type=jnp.float32)
        o = jnp.einsum('gse,ged->gsd', a, out_w, preferred_element_type=jnp.float32)  # (G,S,D)
        attn = jnp.stack(
            [jnp.sum(o[e * NUM_HEADS:(e + 1) * NUM_HEADS], axis=0) for e in range(NENC)],
            axis=0) + out_b                                                # (2,S,D)

        x = _layernorm(x + attn,
                       load(p_ref, 'enc_ln1_g').reshape(NENC, SEQ, D),
                       load(p_ref, 'enc_ln1_b').reshape(NENC, SEQ, D))
        h = jnp.einsum('esd,edh->esh', x,
                       load(p_ref, 'enc_ff_w1').reshape(NENC, D, HIDDEN),
                       preferred_element_type=jnp.float32) \
            + load(p_ref, 'enc_ff_b1').reshape(NENC, SEQ, HIDDEN)
        h = jnp.maximum(h, 0.0)
        h = jnp.einsum('esh,ehd->esd', h,
                       load(p_ref, 'enc_ff_w2').reshape(NENC, HIDDEN, D),
                       preferred_element_type=jnp.float32) \
            + load(p_ref, 'enc_ff_b2').reshape(NENC, SEQ, D)
        x = _layernorm(x + h,
                       load(p_ref, 'enc_ln2_g').reshape(NENC, SEQ, D),
                       load(p_ref, 'enc_ln2_b').reshape(NENC, SEQ, D))

        # ---- cross-attention, seq-len 1 after the module's permute: softmax over a single
        # key == 1, so it reduces exactly to out_proj(value_proj(value)). Both linears are
        # pre-folded into one matrix + bias per direction, applied as one batched einsum.
        cross = jnp.einsum('esd,edk->esk', x,
                           load(p_ref, 'cross_w').reshape(NENC, D, D),
                           preferred_element_type=jnp.float32) \
            + load(p_ref, 'cross_b').reshape(NENC, SEQ, D)    # cross[0]=cross_v, cross[1]=cross_p

        # ---- gated fusion: sigmoid(cross_v @ g_wv + cross_p @ g_wp + g_b) — two matvecs,
        # no lane concatenate, no cross-lane reduction.
        g = jax.nn.sigmoid(
            jnp.dot(cross[0], load(p_ref, 'gate_wv'), preferred_element_type=jnp.float32)
            + jnp.dot(cross[1], load(p_ref, 'gate_wp'), preferred_element_type=jnp.float32)
            + load(p_ref, 'gate_b'))                          # (S, 1)
        combined = g * cross[0] + (1.0 - g) * cross[1]        # (S, D)

        # ---- single lane-dense (SEQ, 128) store: out_pack_w = [I_D | fc_w.T | 0], so one
        # matmul writes [combined | logits | zeros] with an unmasked 128-lane vst.
        out_ref[...] = (jnp.dot(combined, load(p_ref, 'out_pack_w'),
                                preferred_element_type=jnp.float32)
                        + load(p_ref, 'out_pack_b'))

    return kernel


# ---------------- wrapper ----------------
def multimodal_transformer(visual, physiological, param_slab, *, offsets):
    """visual, physiological: (SEQ, MID=1, D) float32.  Returns (logits, combined)."""
    assert MID == 1 and visual.shape == (SEQ, MID, D) and physiological.shape == (SEQ, MID, D)
    x = jnp.stack([visual[:, 0, :], physiological[:, 0, :]], axis=0)   # (2, S, D), one DMA
    vmem = pl.BlockSpec(memory_space=pltpu.MemorySpace.VMEM)
    out_slab = pl.pallas_call(
        _make_kernel(offsets),
        out_shape=jax.ShapeDtypeStruct((SEQ, LANES), jnp.float32),
        in_specs=[vmem, vmem],
        out_specs=vmem,
    )(x, param_slab)
    combined = out_slab[:, :D]
    logits = out_slab[:, D:D + NUM_CLASSES]
    return logits, combined


# ---------------- host-side parameter packing (one lane-dense slab, pre-transposed) --------
def _pack_slab(entries):
    """entries: list of (name, 2-D f32 array with <=128 cols).
    Returns (slab (R,128) f32, offsets {name: (row0, nrows, ncols)}); every block is
    padded to an 8-row multiple so in-kernel views are sublane-tile aligned."""
    offsets, blocks, row = {}, [], 0
    for name, arr in entries:
        arr = jnp.asarray(arr, jnp.float32)
        r, c = arr.shape
        pr, pc = (-r) % 8, LANES - c
        blocks.append(jnp.pad(arr, ((0, pr), (0, pc))))
        offsets[name] = (row, r, c)
        row += r + pr
    return jnp.concatenate(blocks, axis=0), offsets


def pack_params(p):
    entries = []
    add = lambda name, arr: entries.append((name, jnp.asarray(arr, jnp.float32)))
    tile_s = lambda v: jnp.tile(jnp.asarray(v, jnp.float32)[None, :], (SEQ, 1))   # (S, len)

    encs = [p['venc'], p['penc']]   # encoder-major packing order: [visual, physiological]

    in_w_blocks, in_b_blocks, out_w_blocks = [], [], []
    out_b_rows, ln1_g_rows, ln1_b_rows = [], [], []
    ff_w1_rows, ff_b1_rows, ff_w2_rows, ff_b2_rows = [], [], [], []
    ln2_g_rows, ln2_b_rows = [], []
    for e in encs:
        in_w, in_b = e['in_w'], e['in_b']
        wq, wk, wv = in_w[:D], in_w[D:2 * D], in_w[2 * D:]
        bq, bk, bv = in_b[:D], in_b[D:2 * D], in_b[2 * D:]
        for h in range(NUM_HEADS):                                   # head-major within encoder
            sl = slice(h * DH, (h + 1) * DH)
            in_w_blocks.append(jnp.concatenate([wq[sl].T, wk[sl].T, wv[sl].T], axis=1))  # (D,3DH)
            bh = jnp.concatenate([bq[sl], bk[sl], bv[sl]], axis=0)                       # (3DH,)
            in_b_blocks.append(jnp.tile(bh[None, :], (SEQ, 1)))                          # (S,3DH)
        out_w_blocks.append(e['out_w'].T)                 # (D, D); row-blocks of DH are per head
        out_b_rows.append(tile_s(e['out_b']))
        ln1_g_rows.append(tile_s(e['ln1_g'])); ln1_b_rows.append(tile_s(e['ln1_b']))
        ff_w1_rows.append(e['ff_w1'].T);       ff_b1_rows.append(tile_s(e['ff_b1']))
        ff_w2_rows.append(e['ff_w2'].T);       ff_b2_rows.append(tile_s(e['ff_b2']))
        ln2_g_rows.append(tile_s(e['ln2_g'])); ln2_b_rows.append(tile_s(e['ln2_b']))

    add('enc_attn_in_w', jnp.concatenate(in_w_blocks, axis=0))     # (2H*D, 3DH)
    add('enc_attn_in_b', jnp.concatenate(in_b_blocks, axis=0))     # (2H*S, 3DH)
    add('enc_attn_out_w', jnp.concatenate(out_w_blocks, axis=0))   # (2H*DH, D)
    add('enc_attn_out_b', jnp.concatenate(out_b_rows, axis=0))     # (2S, D)
    add('enc_ln1_g', jnp.concatenate(ln1_g_rows, axis=0))
    add('enc_ln1_b', jnp.concatenate(ln1_b_rows, axis=0))
    add('enc_ff_w1', jnp.concatenate(ff_w1_rows, axis=0))          # (2D, HIDDEN)
    add('enc_ff_b1', jnp.concatenate(ff_b1_rows, axis=0))          # (2S, HIDDEN)
    add('enc_ff_w2', jnp.concatenate(ff_w2_rows, axis=0))          # (2*HIDDEN, D)
    add('enc_ff_b2', jnp.concatenate(ff_b2_rows, axis=0))
    add('enc_ln2_g', jnp.concatenate(ln2_g_rows, axis=0))
    add('enc_ln2_b', jnp.concatenate(ln2_b_rows, axis=0))

    def fold_cross(c):
        # seq-len-1 cross attention == out_proj(value_proj(value)); fold both linears.
        wv, bv = c['in_w'][2 * D:], c['in_b'][2 * D:]
        return wv.T @ c['out_w'].T, bv @ c['out_w'].T + c['out_b']

    wv_, bv_ = fold_cross(p['cv'])         # applied to visual encoding  -> cross_v
    wp_, bp_ = fold_cross(p['cp'])         # applied to physiological    -> cross_p
    add('cross_w', jnp.concatenate([wv_, wp_], axis=0))                  # (2D, D)
    add('cross_b', jnp.concatenate([tile_s(bv_), tile_s(bp_)], axis=0))  # (2S, D)

    add('gate_wv', p['g_w'][0, :D][:, None])                             # (D, 1)
    add('gate_wp', p['g_w'][0, D:][:, None])                             # (D, 1)
    add('gate_b', jnp.tile(p['g_b'].reshape(1, 1), (SEQ, 1)))            # (S, 1)

    # Output packer: one matmul writes [combined | logits | zeros] lane-dense.
    w_pack = jnp.zeros((D, LANES), jnp.float32)
    w_pack = w_pack.at[:, :D].set(jnp.eye(D, dtype=jnp.float32))
    w_pack = w_pack.at[:, D:D + NUM_CLASSES].set(p['fc_w'].T)
    b_pack = jnp.zeros((SEQ, LANES), jnp.float32)
    b_pack = b_pack.at[:, D:D + NUM_CLASSES].set(jnp.tile(p['fc_b'][None, :], (SEQ, 1)))
    add('out_pack_w', w_pack)
    add('out_pack_b', b_pack)

    return _pack_slab(entries)


# ---------------- deterministic parameter init (synthetic, no checkpoint) ----------------
def init_params(key):
    keys = iter(jax.random.split(key, 64))

    def nrm(shape, scale=0.1):
        return jax.random.normal(next(keys), shape, jnp.float32) * scale

    def enc():
        return dict(
            in_w=nrm((3 * D, D)), in_b=nrm((3 * D,)),
            out_w=nrm((D, D)), out_b=nrm((D,)),
            ln1_g=jnp.ones((D,), jnp.float32), ln1_b=jnp.zeros((D,), jnp.float32),
            ff_w1=nrm((HIDDEN, D)), ff_b1=nrm((HIDDEN,)),
            ff_w2=nrm((D, HIDDEN)), ff_b2=nrm((D,)),
            ln2_g=jnp.ones((D,), jnp.float32), ln2_b=jnp.zeros((D,), jnp.float32),
        )

    return dict(
        venc=enc(), penc=enc(),
        cv=dict(in_w=nrm((3 * D, D)), in_b=nrm((3 * D,)), out_w=nrm((D, D)), out_b=nrm((D,))),
        cp=dict(in_w=nrm((3 * D, D)), in_b=nrm((3 * D,)), out_w=nrm((D, D)), out_b=nrm((D,))),
        g_w=nrm((1, 2 * D)), g_b=nrm((1,)),
        fc_w=nrm((NUM_CLASSES, D)), fc_b=nrm((NUM_CLASSES,)),
    )


# ---------------- pure-JAX reference (mirrors the PyTorch forward exactly) ----------------
def _ref_ln(x, g, b):
    m = jnp.mean(x, axis=-1, keepdims=True)
    v = jnp.mean((x - m) ** 2, axis=-1, keepdims=True)
    return (x - m) / jnp.sqrt(v + LN_EPS) * g + b


def _ref_mha(query, key, value, in_w, in_b, out_w, out_b, nh):
    Lq, N, Dm = query.shape
    Lk = key.shape[0]
    dh = Dm // nh
    wq, wk, wv = in_w[:Dm], in_w[Dm:2 * Dm], in_w[2 * Dm:]
    bq, bk, bv = in_b[:Dm], in_b[Dm:2 * Dm], in_b[2 * Dm:]
    q = (query @ wq.T + bq).reshape(Lq, N, nh, dh).transpose(1, 2, 0, 3)
    k = (key @ wk.T + bk).reshape(Lk, N, nh, dh).transpose(1, 2, 0, 3)
    v = (value @ wv.T + bv).reshape(Lk, N, nh, dh).transpose(1, 2, 0, 3)
    scores = (q @ jnp.swapaxes(k, -1, -2)) / math.sqrt(dh)
    p = jax.nn.softmax(scores, axis=-1)
    o = (p @ v).transpose(2, 0, 1, 3).reshape(Lq, N, Dm)
    return o @ out_w.T + out_b


def reference_forward(visual, physiological, p):
    def enc(x, e):
        a = _ref_mha(x, x, x, e['in_w'], e['in_b'], e['out_w'], e['out_b'], NUM_HEADS)
        x = _ref_ln(x + a, e['ln1_g'], e['ln1_b'])
        ff = jnp.maximum(x @ e['ff_w1'].T + e['ff_b1'], 0.0) @ e['ff_w2'].T + e['ff_b2']
        return _ref_ln(x + ff, e['ln2_g'], e['ln2_b'])

    ve = enc(visual, p['venc'])
    pe = enc(physiological, p['penc'])
    vp = jnp.transpose(ve, (1, 0, 2))
    pp = jnp.transpose(pe, (1, 0, 2))
    cv = jnp.transpose(_ref_mha(pp, vp, vp, p['cv']['in_w'], p['cv']['in_b'],
                                p['cv']['out_w'], p['cv']['out_b'], NUM_HEADS), (1, 0, 2))
    cpx = jnp.transpose(_ref_mha(vp, pp, pp, p['cp']['in_w'], p['cp']['in_b'],
                                 p['cp']['out_w'], p['cp']['out_b'], NUM_HEADS), (1, 0, 2))
    gate_in = jnp.concatenate([cv, cpx], axis=2)
    g = jax.nn.sigmoid(gate_in @ p['g_w'].T + p['g_b'])
    combined = jnp.squeeze(g * cv + (1.0 - g) * cpx, axis=1)
    return combined @ p['fc_w'].T + p['fc_b'], combined


# ---------------- main ----------------
if __name__ == "__main__":
    root = jax.random.PRNGKey(0)
    k_vis, k_phys, k_par = jax.random.split(root, 3)

    visual = jax.random.normal(k_vis, (SEQ, MID, D), jnp.float32)
    physiological = jax.random.normal(k_phys, (SEQ, MID, D), jnp.float32)

    params = init_params(k_par)
    param_slab, offsets = pack_params(params)   # single lane-dense (rows, 128) f32 slab

    run = jax.jit(functools.partial(multimodal_transformer, offsets=offsets))
    logits, combined = run(visual, physiological, param_slab)
    jax.block_until_ready((logits, combined))

    ref_logits, ref_combined = reference_forward(visual, physiological, params)
    np.testing.assert_allclose(np.asarray(logits), np.asarray(ref_logits), atol=1e-3, rtol=1e-3)
    np.testing.assert_allclose(np.asarray(combined), np.asarray(ref_combined), atol=1e-3, rtol=1e-3)

    assert logits.shape == (SEQ, NUM_CLASSES) and combined.shape == (SEQ, D)
    print("KERNEL_OK")
</pallas_src>

<mosaic_0001>
module attributes {stable_mosaic.version = 11 : i64} {
  func.func @kernel(%arg0: memref<2x8x32xf32, #tpu.memory_space<vmem>>, %arg1: memref<880x128xf32, #tpu.memory_space<vmem>>, %arg2: memref<8x128xf32, #tpu.memory_space<vmem>>) attributes {dimension_semantics = [], scalar_prefetch = 0 : i64, scratch_operands = 0 : i64, tpu.core_type = #tpu.core_type<tc>} {
    %c0 = arith.constant 0 : index
    %c0_0 = arith.constant 0 : index
    %c0_1 = arith.constant 0 : index
    %0 = vector.load %arg0[%c0, %c0_0, %c0_1] : memref<2x8x32xf32, #tpu.memory_space<vmem>>, vector<2x8x32xf32>
    %c0_2 = arith.constant 0 : index
    %c0_3 = arith.constant 0 : index
    %1 = vector.load %arg1[%c0_2, %c0_3] : memref<880x128xf32, #tpu.memory_space<vmem>>, vector<256x24xf32>
    %2 = vector.shape_cast %1 : vector<256x24xf32> to vector<8x32x24xf32>
    %c256 = arith.constant 256 : index
    %c0_4 = arith.constant 0 : index
    %3 = vector.load %arg1[%c256, %c0_4] : memref<880x128xf32, #tpu.memory_space<vmem>>, vector<64x24xf32>
    %4 = vector.shape_cast %3 : vector<64x24xf32> to vector<8x8x24xf32>
    %c320 = arith.constant 320 : index
    %c0_5 = arith.constant 0 : index
    %5 = vector.load %arg1[%c320, %c0_5] : memref<880x128xf32, #tpu.memory_space<vmem>>, vector<64x32xf32>
    %6 = vector.shape_cast %5 : vector<64x32xf32> to vector<8x8x32xf32>
    %c384 = arith.constant 384 : index
    %c0_6 = arith.constant 0 : index
    %7 = vector.load %arg1[%c384, %c0_6] : memref<880x128xf32, #tpu.memory_space<vmem>>, vector<16x32xf32>
    %8 = vector.shape_cast %7 : vector<16x32xf32> to vector<2x8x32xf32>
    %9 = vector.extract_strided_slice %0 {offsets = [0, 0, 0], sizes = [1, 8, 32], strides = [1, 1, 1]} : vector<2x8x32xf32> to vector<1x8x32xf32>
    %10 = vector.shape_cast %9 : vector<1x8x32xf32> to vector<1x8x32xf32>
    %11 = vector.broadcast %10 : vector<1x8x32xf32> to vector<4x8x32xf32>
    %12 = vector.extract_strided_slice %0 {offsets = [1, 0, 0], sizes = [1, 8, 32], strides = [1, 1, 1]} : vector<2x8x32xf32> to vector<1x8x32xf32>
    %13 = vector.shape_cast %12 : vector<1x8x32xf32> to vector<1x8x32xf32>
    %14 = vector.broadcast %13 : vector<1x8x32xf32> to vector<4x8x32xf32>
    %15 = tpu.concatenate %11, %14 in 0 : vector<4x8x32xf32>, vector<4x8x32xf32> -> vector<8x8x32xf32>
    "tpu.trace_start"() <{level = 10 : i32, message = "gsd,gdf->gsf"}> : () -> ()
    %cst = arith.constant dense<0.000000e+00> : vector<8x8x24xf32>
    %16 = tpu.matmul %15, %2, %cst {dimension_numbers = #tpu.dot_dimension_numbers<[2], [1], [1], [2], [0, 0, 0, 1, 1, 2], [0], [0]>} : vector<8x8x32xf32>, vector<8x32x24xf32>, vector<8x8x24xf32> -> vector<8x8x24xf32>
    "tpu.trace_stop"() : () -> ()
    %17 = arith.addf %16, %4 : vector<8x8x24xf32>
    %18 = vector.extract_strided_slice %17 {offsets = [0, 0, 0], sizes = [8, 8, 8], strides = [1, 1, 1]} : vector<8x8x24xf32> to vector<8x8x8xf32>
    %cst_7 = arith.constant 0.353553385 : f32
    %19 = vector.broadcast %cst_7 : f32 to vector<8x8x8xf32>
    %20 = arith.mulf %18, %19 : vector<8x8x8xf32>
    %21 = vector.extract_strided_slice %17 {offsets = [0, 0, 8], sizes = [8, 8, 8], strides = [1, 1, 1]} : vector<8x8x24xf32> to vector<8x8x8xf32>
    %22 = vector.extract_strided_slice %17 {offsets = [0, 0, 16], sizes = [8, 8, 8], strides = [1, 1, 1]} : vector<8x8x24xf32> to vector<8x8x8xf32>
    "tpu.trace_start"() <{level = 10 : i32, message = "gqe,gke->gqk"}> : () -> ()
    %cst_8 = arith.constant dense<0.000000e+00> : vector<8x8x8xf32>
    %23 = tpu.matmul %20, %21, %cst_8 {dimension_numbers = #tpu.dot_dimension_numbers<[2], [2], [1], [1], [0, 0, 0, 1, 1, 1], [0], [0]>} : vector<8x8x8xf32>, vector<8x8x8xf32>, vector<8x8x8xf32> -> vector<8x8x8xf32>
    "tpu.trace_stop"() : () -> ()
    %cst_9 = arith.constant dense<0xFF800000> : vector<8x8xf32>
    %24 = vector.multi_reduction <maximumf>, %23, %cst_9 [2] : vector<8x8x8xf32> to vector<8x8xf32>
    %25 = vector.shape_cast %24 : vector<8x8xf32> to vector<8x8x1xf32>
    %26 = vector.broadcast %25 : vector<8x8x1xf32> to vector<8x8x8xf32>
    %27 = arith.subf %23, %26 : vector<8x8x8xf32>
    %28 = math.exp %27 : vector<8x8x8xf32>
    %cst_10 = arith.constant dense<0.000000e+00> : vector<8x8xf32>
    %29 = vector.multi_reduction <add>, %28, %cst_10 [2] : vector<8x8x8xf32> to vector<8x8xf32>
    %30 = vector.shape_cast %29 : vector<8x8xf32> to vector<8x8x1xf32>
    %31 = vector.broadcast %30 : vector<8x8x1xf32> to vector<8x8x8xf32>
    %32 = arith.divf %28, %31 : vector<8x8x8xf32>
    "tpu.trace_start"() <{level = 10 : i32, message = "gqk,gke->gqe"}> : () -> ()
    %cst_11 = arith.constant dense<0.000000e+00> : vector<8x8x8xf32>
    %33 = tpu.matmul %32, %22, %cst_11 {dimension_numbers = #tpu.dot_dimension_numbers<[2], [1], [1], [2], [0, 0, 0, 1, 1, 2], [0], [0]>} : vector<8x8x8xf32>, vector<8x8x8xf32>, vector<8x8x8xf32> -> vector<8x8x8xf32>
    "tpu.trace_stop"() : () -> ()
    "tpu.trace_start"() <{level = 10 : i32, message = "gse,ged->gsd"}> : () -> ()
    %cst_12 = arith.constant dense<0.000000e+00> : vector<8x8x32xf32>
    %34 = tpu.matmul %33, %6, %cst_12 {dimension_numbers = #tpu.dot_dimension_numbers<[2], [1], [1], [2], [0, 0, 0, 1, 1, 2], [0], [0]>} : vector<8x8x8xf32>, vector<8x8x32xf32>, vector<8x8x32xf32> -> vector<8x8x32xf32>
    "tpu.trace_stop"() : () -> ()
    %35 = vector.extract_strided_slice %34 {offsets = [0, 0, 0], sizes = [4, 8, 32], strides = [1, 1, 1]} : vector<8x8x32xf32> to vector<4x8x32xf32>
    %cst_13 = arith.constant dense<0.000000e+00> : vector<8x32xf32>
    %36 = vector.multi_reduction <add>, %35, %cst_13 [0] : vector<4x8x32xf32> to vector<8x32xf32>
    %37 = vector.extract_strided_slice %34 {offsets = [4, 0, 0], sizes = [4, 8, 32], strides = [1, 1, 1]} : vector<8x8x32xf32> to vector<4x8x32xf32>
    %cst_14 = arith.constant dense<0.000000e+00> : vector<8x32xf32>
    %38 = vector.multi_reduction <add>, %37, %cst_14 [0] : vector<4x8x32xf32> to vector<8x32xf32>
    %39 = vector.shape_cast %36 : vector<8x32xf32> to vector<1x8x32xf32>
    %40 = vector.shape_cast %38 : vector<8x32xf32> to vector<1x8x32xf32>
    %41 = tpu.concatenate %39, %40 in 0 : vector<1x8x32xf32>, vector<1x8x32xf32> -> vector<2x8x32xf32>
    %42 = arith.addf %41, %8 : vector<2x8x32xf32>
    %43 = arith.addf %0, %42 : vector<2x8x32xf32>
    %c400 = arith.constant 400 : index
    %c0_15 = arith.constant 0 : index
    %44 = vector.load %arg1[%c400, %c0_15] : memref<880x128xf32, #tpu.memory_space<vmem>>, vector<16x32xf32>
    %45 = vector.shape_cast %44 : vector<16x32xf32> to vector<2x8x32xf32>
    %c416 = arith.constant 416 : index
    %c0_16 = arith.constant 0 : index
    %46 = vector.load %arg1[%c416, %c0_16] : memref<880x128xf32, #tpu.memory_space<vmem>>, vector<16x32xf32>
    %47 = vector.shape_cast %46 : vector<16x32xf32> to vector<2x8x32xf32>
    %cst_17 = arith.constant dense<0.000000e+00> : vector<2x8xf32>
    %48 = vector.multi_reduction <add>, %43, %cst_17 [2] : vector<2x8x32xf32> to vector<2x8xf32>
    %49 = vector.shape_cast %48 : vector<2x8xf32> to vector<2x8x1xf32>
    %cst_18 = arith.constant 3.200000e+01 : f32
    %50 = vector.broadcast %cst_18 : f32 to vector<2x8x1xf32>
    %51 = arith.divf %49, %50 : vector<2x8x1xf32>
    %52 = vector.broadcast %51 : vector<2x8x1xf32> to vector<2x8x32xf32>
    %53 = arith.subf %43, %52 : vector<2x8x32xf32>
    %54 = arith.mulf %53, %53 : vector<2x8x32xf32>
    %cst_19 = arith.constant dense<0.000000e+00> : vector<2x8xf32>
    %55 = vector.multi_reduction <add>, %54, %cst_19 [2] : vector<2x8x32xf32> to vector<2x8xf32>
    %56 = vector.shape_cast %55 : vector<2x8xf32> to vector<2x8x1xf32>
    %cst_20 = arith.constant 3.200000e+01 : f32
    %57 = vector.broadcast %cst_20 : f32 to vector<2x8x1xf32>
    %58 = arith.divf %56, %57 : vector<2x8x1xf32>
    %59 = vector.broadcast %51 : vector<2x8x1xf32> to vector<2x8x32xf32>
    %60 = arith.subf %43, %59 : vector<2x8x32xf32>
    %cst_21 = arith.constant 9.99999974E-6 : f32
    %61 = vector.broadcast %cst_21 : f32 to vector<2x8x1xf32>
    %62 = arith.addf %58, %61 : vector<2x8x1xf32>
    %63 = math.rsqrt %62 : vector<2x8x1xf32>
    %64 = vector.broadcast %63 : vector<2x8x1xf32> to vector<2x8x32xf32>
    %65 = arith.mulf %60, %64 : vector<2x8x32xf32>
    %66 = arith.mulf %65, %45 : vector<2x8x32xf32>
    %67 = arith.addf %66, %47 : vector<2x8x32xf32>
    %c432 = arith.constant 432 : index
    %c0_22 = arith.constant 0 : index
    %68 = vector.load %arg1[%c432, %c0_22] : memref<880x128xf32, #tpu.memory_space<vmem>>, vector<64x64xf32>
    %69 = vector.shape_cast %68 : vector<64x64xf32> to vector<2x32x64xf32>
    "tpu.trace_start"() <{level = 10 : i32, message = "esd,edh->esh"}> : () -> ()
    %cst_23 = arith.constant dense<0.000000e+00> : vector<2x8x64xf32>
    %70 = tpu.matmul %67, %69, %cst_23 {dimension_numbers = #tpu.dot_dimension_numbers<[2], [1], [1], [2], [0, 0, 0, 1, 1, 2], [0], [0]>} : vector<2x8x32xf32>, vector<2x32x64xf32>, vector<2x8x64xf32> -> vector<2x8x64xf32>
    "tpu.trace_stop"() : () -> ()
    %c496 = arith.constant 496 : index
    %c0_24 = arith.constant 0 : index
    %71 = vector.load %arg1[%c496, %c0_24] : memref<880x128xf32, #tpu.memory_space<vmem>>, vector<16x64xf32>
    %72 = vector.shape_cast %71 : vector<16x64xf32> to vector<2x8x64xf32>
    %73 = arith.addf %70, %72 : vector<2x8x64xf32>
    %cst_25 = arith.constant 0.000000e+00 : f32
    %74 = vector.broadcast %cst_25 : f32 to vector<2x8x64xf32>
    %75 = arith.maximumf %73, %74 : vector<2x8x64xf32>
    %c512 = arith.constant 512 : index
    %c0_26 = arith.constant 0 : index
    %76 = vector.load %arg1[%c512, %c0_26] : memref<880x128xf32, #tpu.memory_space<vmem>>, vector<128x32xf32>
    %77 = vector.shape_cast %76 : vector<128x32xf32> to vector<2x64x32xf32>
    "tpu.trace_start"() <{level = 10 : i32, message = "esh,ehd->esd"}> : () -> ()
    %cst_27 = arith.constant dense<0.000000e+00> : vector<2x8x32xf32>
    %78 = tpu.matmul %75, %77, %cst_27 {dimension_numbers = #tpu.dot_dimension_numbers<[2], [1], [1], [2], [0, 0, 0, 1, 1, 2], [0], [0]>} : vector<2x8x64xf32>, vector<2x64x32xf32>, vector<2x8x32xf32> -> vector<2x8x32xf32>
    "tpu.trace_stop"() : () -> ()
    %c640 = arith.constant 640 : index
    %c0_28 = arith.constant 0 : index
    %79 = vector.load %arg1[%c640, %c0_28] : memref<880x128xf32, #tpu.memory_space<vmem>>, vector<16x32xf32>
    %80 = vector.shape_cast %79 : vector<16x32xf32> to vector<2x8x32xf32>
    %81 = arith.addf %78, %80 : vector<2x8x32xf32>
    %82 = arith.addf %67, %81 : vector<2x8x32xf32>
    %c656 = arith.constant 656 : index
    %c0_29 = arith.constant 0 : index
    %83 = vector.load %arg1[%c656, %c0_29] : memref<880x128xf32, #tpu.memory_space<vmem>>, vector<16x32xf32>
    %84 = vector.shape_cast %83 : vector<16x32xf32> to vector<2x8x32xf32>
    %c672 = arith.constant 672 : index
    %c0_30 = arith.constant 0 : index
    %85 = vector.load %arg1[%c672, %c0_30] : memref<880x128xf32, #tpu.memory_space<vmem>>, vector<16x32xf32>
    %86 = vector.shape_cast %85 : vector<16x32xf32> to vector<2x8x32xf32>
    %cst_31 = arith.constant dense<0.000000e+00> : vector<2x8xf32>
    %87 = vector.multi_reduction <add>, %82, %cst_31 [2] : vector<2x8x32xf32> to vector<2x8xf32>
    %88 = vector.shape_cast %87 : vector<2x8xf32> to vector<2x8x1xf32>
    %cst_32 = arith.constant 3.200000e+01 : f32
    %89 = vector.broadcast %cst_32 : f32 to vector<2x8x1xf32>
    %90 = arith.divf %88, %89 : vector<2x8x1xf32>
    %91 = vector.broadcast %90 : vector<2x8x1xf32> to vector<2x8x32xf32>
    %92 = arith.subf %82, %91 : vector<2x8x32xf32>
    %93 = arith.mulf %92, %92 : vector<2x8x32xf32>
    %cst_33 = arith.constant dense<0.000000e+00> : vector<2x8xf32>
    %94 = vector.multi_reduction <add>, %93, %cst_33 [2] : vector<2x8x32xf32> to vector<2x8xf32>
    %95 = vector.shape_cast %94 : vector<2x8xf32> to vector<2x8x1xf32>
    %cst_34 = arith.constant 3.200000e+01 : f32
    %96 = vector.broadcast %cst_34 : f32 to vector<2x8x1xf32>
    %97 = arith.divf %95, %96 : vector<2x8x1xf32>
    %98 = vector.broadcast %90 : vector<2x8x1xf32> to vector<2x8x32xf32>
    %99 = arith.subf %82, %98 : vector<2x8x32xf32>
    %cst_35 = arith.constant 9.99999974E-6 : f32
    %100 = vector.broadcast %cst_35 : f32 to vector<2x8x1xf32>
    %101 = arith.addf %97, %100 : vector<2x8x1xf32>
    %102 = math.rsqrt %101 : vector<2x8x1xf32>
    %103 = vector.broadcast %102 : vector<2x8x1xf32> to vector<2x8x32xf32>
    %104 = arith.mulf %99, %103 : vector<2x8x32xf32>
    %105 = arith.mulf %104, %84 : vector<2x8x32xf32>
    %106 = arith.addf %105, %86 : vector<2x8x32xf32>
    %c688 = arith.constant 688 : index
    %c0_36 = arith.constant 0 : index
    %107 = vector.load %arg1[%c688, %c0_36] : memref<880x128xf32, #tpu.memory_space<vmem>>, vector<64x32xf32>
    %108 = vector.shape_cast %107 : vector<64x32xf32> to vector<2x32x32xf32>
    "tpu.trace_start"() <{level = 10 : i32, message = "esd,edk->esk"}> : () -> ()
    %cst_37 = arith.constant dense<0.000000e+00> : vector<2x8x32xf32>
    %109 = tpu.matmul %106, %108, %cst_37 {dimension_numbers = #tpu.dot_dimension_numbers<[2], [1], [1], [2], [0, 0, 0, 1, 1, 2], [0], [0]>} : vector<2x8x32xf32>, vector<2x32x32xf32>, vector<2x8x32xf32> -> vector<2x8x32xf32>
    "tpu.trace_stop"() : () -> ()
    %c752 = arith.constant 752 : index
    %c0_38 = arith.constant 0 : index
    %110 = vector.load %arg1[%c752, %c0_38] : memref<880x128xf32, #tpu.memory_space<vmem>>, vector<16x32xf32>
    %111 = vector.shape_cast %110 : vector<16x32xf32> to vector<2x8x32xf32>
    %112 = arith.addf %109, %111 : vector<2x8x32xf32>
    %113 = vector.extract_strided_slice %112 {offsets = [0, 0, 0], sizes = [1, 8, 32], strides = [1, 1, 1]} : vector<2x8x32xf32> to vector<1x8x32xf32>
    %114 = vector.shape_cast %113 : vector<1x8x32xf32> to vector<8x32xf32>
    %c768 = arith.constant 768 : index
    %c0_39 = arith.constant 0 : index
    %115 = vector.load %arg1[%c768, %c0_39] : memref<880x128xf32, #tpu.memory_space<vmem>>, vector<32x1xf32>
    %cst_40 = arith.constant dense<0.000000e+00> : vector<8x1xf32>
    %116 = tpu.matmul %114, %115, %cst_40 {dimension_numbers = #tpu.dot_dimension_numbers<[1], [0], [0], [1], [0, 0, 1, 1], [], []>} : vector<8x32xf32>, vector<32x1xf32>, vector<8x1xf32> -> vector<8x1xf32>
    %117 = vector.extract_strided_slice %112 {offsets = [1, 0, 0], sizes = [1, 8, 32], strides = [1, 1, 1]} : vector<2x8x32xf32> to vector<1x8x32xf32>
    %118 = vector.shape_cast %117 : vector<1x8x32xf32> to vector<8x32xf32>
    %c800 = arith.constant 800 : index
    %c0_41 = arith.constant 0 : index
    %119 = vector.load %arg1[%c800, %c0_41] : memref<880x128xf32, #tpu.memory_space<vmem>>, vector<32x1xf32>
    %cst_42 = arith.constant dense<0.000000e+00> : vector<8x1xf32>
    %120 = tpu.matmul %118, %119, %cst_42 {dimension_numbers = #tpu.dot_dimension_numbers<[1], [0], [0], [1], [0, 0, 1, 1], [], []>} : vector<8x32xf32>, vector<32x1xf32>, vector<8x1xf32> -> vector<8x1xf32>
    %121 = arith.addf %116, %120 : vector<8x1xf32>
    %c832 = arith.constant 832 : index
    %c0_43 = arith.constant 0 : index
    %122 = vector.load %arg1[%c832, %c0_43] : memref<880x128xf32, #tpu.memory_space<vmem>>, vector<8x1xf32>
    %123 = arith.addf %121, %122 : vector<8x1xf32>
    %124 = arith.negf %123 : vector<8x1xf32>
    %125 = math.exp %124 : vector<8x1xf32>
    %cst_44 = arith.constant 1.000000e+00 : f32
    %126 = vector.broadcast %cst_44 : f32 to vector<8x1xf32>
    %127 = arith.addf %126, %125 : vector<8x1xf32>
    %128 = arith.divf %126, %127 : vector<8x1xf32>
    %129 = vector.extract_strided_slice %112 {offsets = [0, 0, 0], sizes = [1, 8, 32], strides = [1, 1, 1]} : vector<2x8x32xf32> to vector<1x8x32xf32>
    %130 = vector.shape_cast %129 : vector<1x8x32xf32> to vector<8x32xf32>
    %131 = vector.broadcast %128 : vector<8x1xf32> to vector<8x32xf32>
    %132 = arith.mulf %131, %130 : vector<8x32xf32>
    %cst_45 = arith.constant 1.000000e+00 : f32
    %133 = vector.broadcast %cst_45 : f32 to vector<8x1xf32>
    %134 = arith.subf %133, %128 : vector<8x1xf32>
    %135 = vector.extract_strided_slice %112 {offsets = [1, 0, 0], sizes = [1, 8, 32], strides = [1, 1, 1]} : vector<2x8x32xf32> to vector<1x8x32xf32>
    %136 = vector.shape_cast %135 : vector<1x8x32xf32> to vector<8x32xf32>
    %137 = vector.broadcast %134 : vector<8x1xf32> to vector<8x32xf32>
    %138 = arith.mulf %137, %136 : vector<8x32xf32>
    %139 = arith.addf %132, %138 : vector<8x32xf32>
    %c840 = arith.constant 840 : index
    %c0_46 = arith.constant 0 : index
    %140 = vector.load %arg1[%c840, %c0_46] : memref<880x128xf32, #tpu.memory_space<vmem>>, vector<32x128xf32>
    %cst_47 = arith.constant dense<0.000000e+00> : vector<8x128xf32>
    %141 = tpu.matmul %139, %140, %cst_47 {dimension_numbers = #tpu.dot_dimension_numbers<[1], [0], [0], [1], [0, 0, 1, 1], [], []>} : vector<8x32xf32>, vector<32x128xf32>, vector<8x128xf32> -> vector<8x128xf32>
    %c872 = arith.constant 872 : index
    %c0_48 = arith.constant 0 : index
    %142 = vector.load %arg1[%c872, %c0_48] : memref<880x128xf32, #tpu.memory_space<vmem>>, vector<8x128xf32>
    %143 = arith.addf %141, %142 : vector<8x128xf32>
    %c0_49 = arith.constant 0 : index
    %c0_50 = arith.constant 0 : index
    %144 = vector.load %arg2[%c0_49, %c0_50] : memref<8x128xf32, #tpu.memory_space<vmem>>, vector<8x128xf32>
    tpu.vector_store %arg2[%c0_49, %c0_50], %143 {strides = array<i32>} : memref<8x128xf32, #tpu.memory_space<vmem>>, vector<8x128xf32>,
    return
  }
}

</mosaic_0001>

<bundles_post_ra>
// kernel: multimodal_transformer.1
= control target key start
LH: loop header
LB: loop body
LE: loop exit
PB: predicated region body
PF: predicated region fallthrough
CT: control target
= control target key end

     0   :  { %7 = vsyncpa [#allocation3], 0  ;;  %s3975_s9 = smov [#allocation2]   ;;  %s4361_s0 = inlined_call_operand.vmem [shape: f32[2,8,32], index: 0, kind: input, shape index: {}]   ;;  %s4362_s1 = inlined_call_operand.hbm [shape: f32[880,128], index: 1, kind: input, shape index: {}]   ;;  %s4363_s2 = inlined_call_operand.vmem [shape: f32[8,128], index: 2, kind: output, shape index: {}]  }
   0x1   :  { %s15_s10 = sshll.u32 %s3975_s9, 4  ;;  %s16_s10 = int_to_ptr.vmem [resolvable:$true] %s15_s10 }
   0x2   :  { %s3961_s11 = scalar_lea.vmem %s16_s10, 14080  ;;  %p3966_p1 = scmp.lt.s32.totalorder %s16_s10, %s16_s10 }
   0x3   :  { %p3962_p0 = scmp.ne.s32.totalorder %s16_s10, %s3961_s11  ;;  %p3967_p2 = scmp.lt.s32.totalorder %s3961_s11, %s3961_s11 }
   0x5   :  { %p3968_p3 = por %p3967_p2, %p3966_p1 }
   0x7   :  { %p3969_p4 = pnand %p3968_p3, %p3962_p0 }
   0x9   :  { %3972 = shalt.err (!%p3969_p4)
}
   0xa   :  { %s3976_s12 = smov 128   ;;  %s3977_s13 = smov 8  }
   0xb   :  { %21 = dma.hbm_to_vmem [thread:$0]  %s4362_s1, 14080, %s16_s10, [#allocation3], %s3976_s12, %s3976_s12, %s3977_s13  }
   0xc   :  { %3973 = dma.done.wait [#allocation3], 14080  }
   0xd   :  { %3974 = vsyncadd [#allocation3], 4294953216  ;;  %v3978_v0 = vmov 0.0   ;;  %vm3979_vm0 = vmmov 0   ;;  %v30_v1 = vld [vmem:[#allocation2 + $0x18] sm:$0xff]  ;;  %v29_v3 = vld [vmem:[#allocation2 + $0x10] sm:$0xff] }
   0xe   :  { %3576 = vmatprep.subr.mxu0 %v3978_v0  ;;  %3587 = vmatprep.subr.mxu1 %v3978_v0  ;;  %v34_v2 = vld [vmem:[#allocation2 + $0x38] sm:$0xff]  ;;  %v33_v4 = vld [vmem:[#allocation2 + $0x30] sm:$0xff]  ;;  %v28_v5 = vld [vmem:[#allocation2 + $0x8] sm:$0xff]  ;;  %vm77_vm1 = vcmask 261120   ;;  %vm655_vm2 = vcmask 64512   ;;  %s3981_s19 = smov 112  }
   0xf   :  { %3584 = vmatprep.mubr.msk.f32.mxu0 %vm3979_vm0, %v3978_v0  ;;  %3595 = vmatprep.mubr.msk.f32.mxu1 %vm3979_vm0, %v3978_v0  ;;  %v32_v6 = vld [vmem:[#allocation2 + $0x28] sm:$0xff]  ;;  %v27_v7 = vld [vmem:[#allocation2] sm:$0xff]  ;;  %v38_v10 = vld [vmem:[#allocation2 + $0x58] sm:$0xff]  ;;  %vm2786_vm3 = vcmask 523264  }
  0x10   :  { %3577 = vmatpush3.msra.mxu0 %v30_v1  ;;  %3588 = vmatpush3.msra.mxu1 %v34_v2  ;;  %v31_v8 = vld [vmem:[#allocation2 + $0x20] sm:$0xff]  ;;  %v42_v11 = vld [vmem:[#allocation2 + $0x78] sm:$0xff]  ;;  %v37_v12 = vld [vmem:[#allocation2 + $0x50] sm:$0xff] }
  0x11   :  { %3578 = vmatprep.subr.mxu0 %v3978_v0  ;;  %3589 = vmatprep.subr.mxu1 %v3978_v0  ;;  %v4014_v9 = vld [vmem:[%s4361_s0] sm:$0xff]  ;;  %v41_v13 = vld [vmem:[#allocation2 + $0x70] sm:$0xff]  ;;  %v36_v14 = vld [vmem:[#allocation2 + $0x48] sm:$0xff] }
  0x12   :  { %3579 = vmatpush3.msra.mxu0 %v29_v3  ;;  %3590 = vmatpush3.msra.mxu1 %v33_v4  ;;  %v40_v15 = vld [vmem:[#allocation2 + $0x68] sm:$0xff]  ;;  %v35_v16 = vld [vmem:[#allocation2 + $0x40] sm:$0xff]  ;;  %v46_v18 = vld [vmem:[#allocation2 + $0x98] sm:$0xff] }
  0x13   :  { %3580 = vmatprep.subr.mxu0 %v3978_v0  ;;  %3591 = vmatprep.subr.mxu1 %v3978_v0  ;;  %v39_v17 = vld [vmem:[#allocation2 + $0x60] sm:$0xff]  ;;  %v50_v19 = vld [vmem:[#allocation2 + $0xb8] sm:$0xff]  ;;  %v45_v20 = vld [vmem:[#allocation2 + $0x90] sm:$0xff] }
  0x14   :  { %3581 = vmatpush3.msra.mxu0 %v28_v5  ;;  %3592 = vmatpush3.msra.mxu1 %v32_v6  ;;  %v49_v21 = vld [vmem:[#allocation2 + $0xb0] sm:$0xff]  ;;  %v44_v22 = vld [vmem:[#allocation2 + $0x88] sm:$0xff]  ;;  %v43_v24 = vld [vmem:[#allocation2 + $0x80] sm:$0xff] }
  0x15   :  { %3582 = vmatprep.subr.mxu0 %v3978_v0  ;;  %3593 = vmatprep.subr.mxu1 %v3978_v0  ;;  %v48_v23 = vld [vmem:[#allocation2 + $0xa8] sm:$0xff]  ;;  %v47_v25 = vld [vmem:[#allocation2 + $0xa0] sm:$0xff]  ;;  %v54_v27 = vld [vmem:[#allocation2 + $0xd8] sm:$0xff] }
  0x16   :  { %3583 = vmatpush3.msra.mxu0 %v27_v7  ;;  %3594 = vmatpush3.msra.mxu1 %v31_v8  ;;  %v4049_v26 = vld [vmem:[%s4361_s0 + $0x8] sm:$0xff]  ;;  %v58_v28 = vld [vmem:[#allocation2 + $0xf8] sm:$0xff]  ;;  %v53_v29 = vld [vmem:[#allocation2 + $0xd0] sm:$0xff]  ;;  %s3980_s0 = smov 120  }
  0x17   :  { %3585 = vmatmul.mubr.msk.f32.vlgmr.msra.gmra.mxu0 %vm77_vm1, %v4014_v9  ;;  %3598 = vmatprep.subr.mxu0 %v3978_v0  ;;  %v57_v30 = vld [vmem:[#allocation2 + $0xf0] sm:$0xff]  ;;  %v52_v31 = vld [vmem:[#allocation2 + $0xc8] sm:$0xff]  ;;  %v51_v33 = vld [vmem:[#allocation2 + $0xc0] sm:$0xff] }
  0x18   :  { %3609 = vmatprep.subr.mxu1 %v3978_v0  ;;  %3596 = vmatmul.mubr.msk.f32.vlgmr.msra.gmra.mxu1 %vm77_vm1, %v4014_v9  ;;  %v56_v32 = vld [vmem:[#allocation2 + $0xe8] sm:$0xff]  ;;  %v55_v34 = vld [vmem:[#allocation2 + $0xe0] sm:$0xff]  ;;  %v61_v43 = vld [vmem:[#allocation2 + $0x110] sm:$0xff] }
  0x19   :  { %3599 = vmatpush3.msra.mxu0 %v38_v10  ;;  %3610 = vmatpush3.msra.mxu1 %v42_v11  ;;  %v59_v35 = vld [vmem:[#allocation2 + $0x100] sm:$0xff]  ;;  %v60_v37 = vld [vmem:[#allocation2 + $0x108] sm:$0xff]  ;;  %v62_v45 = vld [vmem:[#allocation2 + $0x118] sm:$0xff] }
  0x1a   :  { %3600 = vmatprep.subr.mxu0 %v3978_v0  ;;  %3611 = vmatprep.subr.mxu1 %v3978_v0  ;;  %v63_v51 = vld [vmem:[#allocation2 + $0x120] sm:$0xff]  ;;  %v64_v52 = vld [vmem:[#allocation2 + $0x128] sm:$0xff]  ;;  %v65_v59 = vld [vmem:[#allocation2 + $0x130] sm:$0xff] }
  0x1b   :  { %3601 = vmatpush3.msra.mxu0 %v37_v12  ;;  %3612 = vmatpush3.msra.mxu1 %v41_v13  ;;  %v66_v60 = vld [vmem:[#allocation2 + $0x138] sm:$0xff] }
  0x1c   :  { %3602 = vmatprep.subr.mxu0 %v3978_v0  ;;  %3613 = vmatprep.subr.mxu1 %v3978_v0 }
  0x1d   :  { %3603 = vmatpush3.msra.mxu0 %v36_v14  ;;  %3614 = vmatpush3.msra.mxu1 %v40_v15 }
  0x1e   :  { %3604 = vmatprep.subr.mxu0 %v3978_v0  ;;  %3615 = vmatprep.subr.mxu1 %v3978_v0 }
  0x1f   :  { %3605 = vmatpush3.msra.mxu0 %v35_v16  ;;  %3606 = vmatprep.mubr.msk.f32.mxu0 %vm3979_vm0, %v3978_v0 }
  0x20   :  { %3616 = vmatpush3.msra.mxu1 %v39_v17  ;;  %3607 = vmatmul.mubr.msk.f32.vlgmr.msra.gmra.mxu0 %vm77_vm1, %v4014_v9 }
  0x21   :  { %3617 = vmatprep.mubr.msk.f32.mxu1 %vm3979_vm0, %v3978_v0  ;;  %3620 = vmatprep.subr.mxu0 %v3978_v0 }
  0x22   :  { %3631 = vmatprep.subr.mxu1 %v3978_v0  ;;  %3618 = vmatmul.mubr.msk.f32.vlgmr.msra.gmra.mxu1 %vm77_vm1, %v4014_v9 }
  0x23   :  { %3621 = vmatpush3.msra.mxu0 %v46_v18  ;;  %3632 = vmatpush3.msra.mxu1 %v50_v19 }
  0x24   :  { %3622 = vmatprep.subr.mxu0 %v3978_v0  ;;  %3633 = vmatprep.subr.mxu1 %v3978_v0 }
  0x25   :  { %3623 = vmatpush3.msra.mxu0 %v45_v20  ;;  %3634 = vmatpush3.msra.mxu1 %v49_v21 }
  0x26   :  { %3624 = vmatprep.subr.mxu0 %v3978_v0  ;;  %3635 = vmatprep.subr.mxu1 %v3978_v0 }
  0x27   :  { %3625 = vmatpush3.msra.mxu0 %v44_v22  ;;  %3636 = vmatpush3.msra.mxu1 %v48_v23 }
  0x28   :  { %3626 = vmatprep.subr.mxu0 %v3978_v0  ;;  %3637 = vmatprep.subr.mxu1 %v3978_v0 }
  0x29   :  { %3627 = vmatpush3.msra.mxu0 %v43_v24  ;;  %3628 = vmatprep.mubr.msk.f32.mxu0 %vm3979_vm0, %v3978_v0 }
  0x2a   :  { %3638 = vmatpush3.msra.mxu1 %v47_v25  ;;  %3639 = vmatprep.mubr.msk.f32.mxu1 %vm3979_vm0, %v3978_v0 }
  0x2b   :  { %3629 = vmatmul.mubr.msk.f32.vlgmr.msra.gmra.mxu0 %vm77_vm1, %v4049_v26  ;;  %3640 = vmatmul.mubr.msk.f32.vlgmr.msra.gmra.mxu1 %vm77_vm1, %v4049_v26 }
  0x2c   :  { %3642 = vmatprep.subr.mxu0 %v3978_v0  ;;  %3653 = vmatprep.subr.mxu1 %v3978_v0 }
  0x2d   :  { %3643 = vmatpush3.msra.mxu0 %v54_v27  ;;  %3654 = vmatpush3.msra.mxu1 %v58_v28 }
  0x2e   :  { %3644 = vmatprep.subr.mxu0 %v3978_v0  ;;  %3655 = vmatprep.subr.mxu1 %v3978_v0 }
  0x2f   :  { %3645 = vmatpush3.msra.mxu0 %v53_v29  ;;  %3656 = vmatpush3.msra.mxu1 %v57_v30 }
  0x30   :  { %3646 = vmatprep.subr.mxu0 %v3978_v0  ;;  %3657 = vmatprep.subr.mxu1 %v3978_v0 }
  0x31   :  { %3647 = vmatpush3.msra.mxu0 %v52_v31  ;;  %3658 = vmatpush3.msra.mxu1 %v56_v32 }
  0x32   :  { %3648 = vmatprep.subr.mxu0 %v3978_v0  ;;  %3659 = vmatprep.subr.mxu1 %v3978_v0 }
  0x33   :  { %3649 = vmatpush3.msra.mxu0 %v51_v33  ;;  %3650 = vmatprep.mubr.msk.f32.mxu0 %vm3979_vm0, %v3978_v0 }
  0x34   :  { %3660 = vmatpush3.msra.mxu1 %v55_v34  ;;  %3661 = vmatprep.mubr.msk.f32.mxu1 %vm3979_vm0, %v3978_v0 }
  0x35   :  { %3651 = vmatmul.mubr.msk.f32.vlgmr.msra.gmra.mxu0 %vm77_vm1, %v4049_v26  ;;  %3662 = vmatmul.mubr.msk.f32.vlgmr.msra.gmra.mxu1 %vm77_vm1, %v4049_v26 }
  0x36   :  { %3664 = vmatprep.subr.mxu1 %v3978_v0  ;;  %3666 = vmatprep.mubr.msk.f32.mxu1 %vm3979_vm0, %v3978_v0 }
  0x37   :  { %3674 = vmatprep.subr.mxu0 %v3978_v0  ;;  %3676 = vmatprep.mubr.msk.f32.mxu0 %vm3979_vm0, %v3978_v0 }
  0xd7   :  { %v147_v36 = vpop.f32.mrf.mxu0 }
  0xd8   :  { %v4081_v38 = vadd.f32 %v147_v36, %v59_v35  ;;  %v217_v39 = vpop.f32.mrf.mxu1 }
  0xd9   :  { %v3586_v40 = vpop.f32.mrf.mxu0  ;;  %v4083_v41 = vadd.f32 %v217_v39, %v60_v37 }
  0xda   :  { %v3597_v42 = vpop.f32.mrf.mxu1  ;;  %653 = vrot.lane.b32.xlu0 %v4081_v38, %s3980_s0  ;;  %v644_v5 = vmul.f32 0.35355338, %v4081_v38 }
  0xdb   :  { %v645_v7 = vmul.f32 0.35355338, %v4083_v41 }
  0xde   :  { %732 = vrot.lane.b32.xlu0 %v4083_v41, %s3980_s0 }
  0xe0   :  { %v287_v44 = vpop.f32.mrf.mxu0 }
  0xe1   :  { %v4089_v46 = vadd.f32 %v287_v44, %v61_v43 }
  0xe2   :  { %v357_v47 = vpop.f32.mrf.mxu1  ;;  %v3608_v48 = vpop.f32.mrf.mxu0 }
  0xe3   :  { %v4091_v49 = vadd.f32 %v357_v47, %v62_v45  ;;  %810 = vrot.lane.b32.xlu1 %v4089_v46, %s3980_s0  ;;  %v646_v10 = vmul.f32 0.35355338, %v4089_v46 }
  0xe4   :  { %v3619_v50 = vpop.f32.mrf.mxu1 }
  0xe5   :  { %v647_v12 = vmul.f32 0.35355338, %v4091_v49 }
  0xe7   :  { %888 = vrot.lane.b32.xlu1 %v4091_v49, %s3980_s0 }
  0xeb   :  { %v430_v53 = vpop.f32.mrf.mxu0  ;;  %v500_v54 = vpop.f32.mrf.mxu1 }
  0xec   :  { %v4097_v55 = vadd.f32 %v430_v53, %v63_v51  ;;  %v4099_v56 = vadd.f32 %v500_v54, %v64_v52 }
  0xed   :  { %v3630_v57 = vpop.f32.mrf.mxu0  ;;  %v3641_v58 = vpop.f32.mrf.mxu1 }
  0xee   :  { %1044 = vrot.lane.b32.xlu1 %v4099_v56, %s3980_s0  ;;  %966 = vrot.lane.b32.xlu0 %v4097_v55, %s3980_s0  ;;  %v648_v15 = vmul.f32 0.35355338, %v4097_v55  ;;  %v649_v16 = vmul.f32 0.35355338, %v4099_v56 }
  0xf5   :  { %v570_v61 = vpop.f32.mrf.mxu0  ;;  %v640_v62 = vpop.f32.mrf.mxu1 }
  0xf6   :  { %v4105_v63 = vadd.f32 %v570_v61, %v65_v59  ;;  %v4107_v1 = vadd.f32 %v640_v62, %v66_v60 }
  0xf7   :  { %v3652_v2 = vpop.f32.mrf.mxu0  ;;  %v3663_v3 = vpop.f32.mrf.mxu1 }
  0xf8   :  { %1200 = vrot.lane.b32.xlu1 %v4107_v1, %s3980_s0  ;;  %1122 = vrot.lane.b32.xlu0 %v4105_v63, %s3980_s0  ;;  %v650_v19 = vmul.f32 0.35355338, %v4105_v63  ;;  %v651_v20 = vmul.f32 0.35355338, %v4107_v1 }
 0x14c   :  { %v654_v4 = vpop.permute.xlu0 %653 }
 0x14d   :  { %3665 = vmatpush3.xpose.msk.msra.mxu1 %vm655_vm2, %v654_v4 }
 0x14e   :  { %3669 = vmatprep.subr.mxu1 %v3978_v0 }
 0x150   :  { %v733_v6 = vpop.permute.xlu0 %732  ;;  %3667 = vmatmul.mubr.msk.f32.vlgmr.msra.gmra.mxu1 %vm655_vm2, %v644_v5 }
 0x151   :  { %3670 = vmatpush3.xpose.msk.msra.mxu1 %vm655_vm2, %v733_v6  ;;  %3671 = vmatprep.mubr.msk.f32.mxu1 %vm3979_vm0, %v3978_v0 }
 0x152   :  { %3679 = vmatprep.subr.mxu1 %v3978_v0 }
 0x154   :  { %3672 = vmatmul.mubr.msk.f32.vlgmr.msra.gmra.mxu1 %vm655_vm2, %v645_v7 }
 0x155   :  { %v811_v8 = vpop.permute.xlu1 %810  ;;  %3681 = vmatprep.mubr.msk.f32.mxu1 %vm3979_vm0, %v3978_v0 }
 0x156   :  { %3675 = vmatpush3.xpose.msk.msra.mxu0 %vm655_vm2, %v811_v8 }
 0x157   :  { %3684 = vmatprep.subr.mxu0 %v3978_v0 }
 0x159   :  { %v889_v11 = vpop.permute.xlu1 %888  ;;  %3677 = vmatmul.mubr.msk.f32.vlgmr.msra.gmra.mxu0 %vm655_vm2, %v646_v10 }
 0x15a   :  { %3680 = vmatpush3.xpose.msk.msra.mxu1 %vm655_vm2, %v889_v11  ;;  %3686 = vmatprep.mubr.msk.f32.mxu0 %vm3979_vm0, %v3978_v0 }
 0x15b   :  { %3689 = vmatprep.subr.mxu1 %v3978_v0 }
 0x15d   :  { %3682 = vmatmul.mubr.msk.f32.vlgmr.msra.gmra.mxu1 %vm655_vm2, %v647_v12 }
 0x15e   :  { %3691 = vmatprep.mubr.msk.f32.mxu1 %vm3979_vm0, %v3978_v0 }
 0x160   :  { %v1045_v13 = vpop.permute.xlu1 %1044  ;;  %v967_v14 = vpop.permute.xlu0 %966 }
 0x161   :  { %3685 = vmatpush3.xpose.msk.msra.mxu0 %vm655_vm2, %v967_v14  ;;  %3690 = vmatpush3.xpose.msk.msra.mxu1 %vm655_vm2, %v1045_v13 }
 0x162   :  { %3699 = vmatprep.subr.mxu1 %v3978_v0  ;;  %3694 = vmatprep.subr.mxu0 %v3978_v0 }
 0x164   :  { %3687 = vmatmul.mubr.msk.f32.vlgmr.msra.gmra.mxu0 %vm655_vm2, %v648_v15  ;;  %3692 = vmatmul.mubr.msk.f32.vlgmr.msra.gmra.mxu1 %vm655_vm2, %v649_v16 }
 0x165   :  { %3696 = vmatprep.mubr.msk.f32.mxu0 %vm3979_vm0, %v3978_v0  ;;  %3701 = vmatprep.mubr.msk.f32.mxu1 %vm3979_vm0, %v3978_v0 }
 0x16a   :  { %v1201_v17 = vpop.permute.xlu1 %1200  ;;  %v1123_v18 = vpop.permute.xlu0 %1122 }
 0x16b   :  { %3695 = vmatpush3.xpose.msk.msra.mxu0 %vm655_vm2, %v1123_v18  ;;  %3700 = vmatpush3.xpose.msk.msra.mxu1 %vm655_vm2, %v1201_v17 }
 0x16c   :  { %3704 = vmatprep.subr.mxu0 %v3978_v0  ;;  %3709 = vmatprep.subr.mxu1 %v3978_v0 }
 0x16e   :  { %3697 = vmatmul.mubr.msk.f32.vlgmr.msra.gmra.mxu0 %vm655_vm2, %v650_v19  ;;  %3702 = vmatmul.mubr.msk.f32.vlgmr.msra.gmra.mxu1 %vm655_vm2, %v651_v20 }
 0x16f   :  { %3706 = vmatprep.mubr.msk.f32.mxu0 %vm3979_vm0, %v3978_v0  ;;  %3711 = vmatprep.mubr.msk.f32.mxu1 %vm3979_vm0, %v3978_v0 }
 0x210   :  { %v727_v21 = vpop.f32.mrf.mxu1 }
 0x211   :  { %v1277_v22 = vsel %vm655_vm2, %v727_v21, -inf }
 0x212   :  { %v3668_v23 = vpop.f32.mrf.mxu1  ;;  %1278 = vmax.xlane.f32.xlu0 %v1277_v22 }
 0x214   :  { %v805_v24 = vpop.f32.mrf.mxu1 }
 0x215   :  { %v1280_v25 = vsel %vm655_vm2, %v805_v24, -inf }
 0x216   :  { %v3673_v27 = vpop.f32.mrf.mxu1  ;;  %1281 = vmax.xlane.f32.xlu1 %v1280_v25 }
 0x219   :  { %v883_v28 = vpop.f32.mrf.mxu0 }
 0x21a   :  { %v1283_v29 = vsel %vm655_vm2, %v883_v28, -inf }
 0x21b   :  { %1284 = vmax.xlane.f32.xlu0 %v1283_v29  ;;  %v3678_v30 = vpop.f32.mrf.mxu0 }
 0x21d   :  { %v961_v31 = vpop.f32.mrf.mxu1 }
 0x21e   :  { %v1286_v32 = vsel %vm655_vm2, %v961_v31, -inf }
 0x21f   :  { %v3683_v33 = vpop.f32.mrf.mxu1  ;;  %1287 = vmax.xlane.f32.xlu0 %v1286_v32 }
 0x224   :  { %v1039_v34 = vpop.f32.mrf.mxu0  ;;  %v1117_v35 = vpop.f32.mrf.mxu1 }
 0x225   :  { %v1292_v36 = vsel %vm655_vm2, %v1117_v35, -inf  ;;  %v1289_v37 = vsel %vm655_vm2, %v1039_v34, -inf }
 0x226   :  { %v3693_v39 = vpop.f32.mrf.mxu1  ;;  %1293 = vmax.xlane.f32.xlu0 %v1292_v36  ;;  %1290 = vmax.xlane.f32.xlu1 %v1289_v37  ;;  %v3688_v40 = vpop.f32.mrf.mxu0 }
 0x22e   :  { %v1195_v42 = vpop.f32.mrf.mxu0  ;;  %v1273_v43 = vpop.f32.mrf.mxu1 }
 0x22f   :  { %v1298_v44 = vsel %vm655_vm2, %v1273_v43, -inf  ;;  %v1295_v45 = vsel %vm655_vm2, %v1195_v42, -inf }
 0x230   :  { %v3703_v47 = vpop.f32.mrf.mxu1  ;;  %1299 = vmax.xlane.f32.xlu0 %v1298_v44  ;;  %1296 = vmax.xlane.f32.xlu1 %v1295_v45  ;;  %v3698_v48 = vpop.f32.mrf.mxu0 }
 0x241   :  { %1365 = vrot.lane.b32.xlu1 %v4081_v38, %s3981_s19 }
 0x245   :  { %1517 = vrot.lane.b32.xlu1 %v4089_v46, %s3981_s19 }
 0x246   :  { %1441 = vrot.lane.b32.xlu0 %v4083_v41, %s3981_s19 }
 0x249   :  { %1593 = vrot.lane.b32.xlu1 %v4091_v49, %s3981_s19 }
 0x24a   :  { %1669 = vrot.lane.b32.xlu0 %v4097_v55, %s3981_s19 }
 0x24d   :  { %1745 = vrot.lane.b32.xlu1 %v4099_v56, %s3981_s19 }
 0x29b   :  { %v1279_v50 = vpop.xlane.xlu0 %1278 }
 0x29c   :  { %v1301_v51 = vsub.f32 %v727_v21, %v1279_v50 }
 0x29e   :  { %v1309_v52 = vmul.f32 1.442695, %v1301_v51 }
 0x29f   :  { %v1282_v53 = vpop.xlane.xlu1 %1281 }
 0x2a0   :  { %3909 = vpow2.f32 %v1309_v52  ;;  %v1302_v38 = vsub.f32 %v805_v24, %v1282_v53 }
 0x2a2   :  { %v1311_v54 = vmul.f32 1.442695, %v1302_v38 }
 0x2a4   :  { %3911 = vpow2.f32 %v1311_v54  ;;  %v1285_v46 = vpop.xlane.xlu0 %1284 }
 0x2a5   :  { %v1303_v57 = vsub.f32 %v883_v28, %v1285_v46 }
 0x2a7   :  { %v1313_v41 = vmul.f32 1.442695, %v1303_v57 }
 0x2a8   :  { %v1288_v58 = vpop.xlane.xlu0 %1287 }
 0x2a9   :  { %3913 = vpow2.f32 %v1313_v41  ;;  %v1304_v49 = vsub.f32 %v961_v31, %v1288_v58 }
 0x2ab   :  { %v1315_v59 = vmul.f32 1.442695, %v1304_v49 }
 0x2ad   :  { %v3910_v60 = vpop.eup %3909  ;;  %3915 = vpow2.f32 %v1315_v59  ;;  %v67_v59 = vld [vmem:[#allocation2 + $0x140] sm:$0xff] }
 0x2ae   :  { %v1325_v55 = vsel %vm655_vm2, %v3910_v60, 0.0 }
 0x2af   :  { %v1294_v56 = vpop.xlane.xlu0 %1293  ;;  %v1291_v61 = vpop.xlane.xlu1 %1290  ;;  %1326 = vadd.xlane.f32.xlu1 %v1325_v55  ;;  %v69_v55 = vld [vmem:[#allocation2 + $0x150] sm:$0xff] }
 0x2b0   :  { %v1306_v62 = vsub.f32 %v1117_v35, %v1294_v56  ;;  %v1305_v2 = vsub.f32 %v1039_v34, %v1291_v61 }
 0x2b1   :  { %v3912_v3 = vpop.eup %3911 }
 0x2b2   :  { %v1319_v4 = vmul.f32 1.442695, %v1306_v62  ;;  %v1317_v5 = vmul.f32 1.442695, %v1305_v2  ;;  %v1328_v6 = vsel %vm655_vm2, %v3912_v3, 0.0  ;;  %v70_v62 = vld [vmem:[#allocation2 + $0x158] sm:$0xff] }
 0x2b3   :  { %1329 = vadd.xlane.f32.xlu0 %v1328_v6 }
 0x2b4   :  { %3917 = vpow2.f32 %v1319_v4  ;;  %v71_v4 = vld [vmem:[#allocation2 + $0x160] sm:$0xff] }
 0x2b5   :  { %3919 = vpow2.f32 %v1317_v5 }
 0x2b6   :  { %v4183_v7 = vpop.eup %3913 }
 0x2b7   :  { %v1331_v8 = vsel %vm655_vm2, %v4183_v7, 0.0 }
 0x2b8   :  { %1332 = vadd.xlane.f32.xlu1 %v1331_v8 }
 0x2b9   :  { %v1300_v10 = vpop.xlane.xlu0 %1299  ;;  %v1297_v11 = vpop.xlane.xlu1 %1296 }
 0x2ba   :  { %v4187_v12 = vpop.eup %3915  ;;  %v1308_v13 = vsub.f32 %v1273_v43, %v1300_v10  ;;  %v1307_v14 = vsub.f32 %v1195_v42, %v1297_v11  ;;  %v74_v11 = vld [vmem:[#allocation2 + $0x178] sm:$0xff] }
 0x2bb   :  { %v1334_v15 = vsel %vm655_vm2, %v4187_v12, 0.0 }
 0x2bc   :  { %v1323_v16 = vmul.f32 1.442695, %v1308_v13  ;;  %v1321_v17 = vmul.f32 1.442695, %v1307_v14  ;;  %1335 = vadd.xlane.f32.xlu0 %v1334_v15  ;;  %v73_v13 = vld [vmem:[#allocation2 + $0x170] sm:$0xff] }
 0x2bd   :  { %v1442_v18 = vpop.permute.xlu0 %1441  ;;  %v1366_v19 = vpop.permute.xlu1 %1365 }
 0x2be   :  { %3921 = vpow2.f32 %v1323_v16  ;;  %3705 = vmatpush3.msra.mxu0 %v1366_v19  ;;  %3710 = vmatpush3.msra.mxu1 %v1442_v18 }
 0x2bf   :  { %3923 = vpow2.f32 %v1321_v17  ;;  %3714 = vmatprep.subr.mxu0 %v3978_v0  ;;  %3719 = vmatprep.subr.mxu1 %v3978_v0 }
 0x2c1   :  { %v3918_v20 = vpop.eup %3917  ;;  %v1518_v29 = vpop.permute.xlu1 %1517 }
 0x2c2   :  { %v3920_v21 = vpop.eup %3919  ;;  %v1340_v22 = vsel %vm655_vm2, %v3918_v20, 0.0  ;;  %v1670_v32 = vpop.permute.xlu0 %1669 }
 0x2c3   :  { %1341 = vadd.xlane.f32.xlu0 %v1340_v22  ;;  %v1337_v23 = vsel %vm655_vm2, %v3920_v21, 0.0 }
 0x2c4   :  { %1338 = vadd.xlane.f32.xlu1 %v1337_v23 }
 0x2c5   :  { %v1594_v30 = vpop.permute.xlu1 %1593 }
 0x2c9   :  { %v1746_v31 = vpop.permute.xlu1 %1745 }
 0x2cb   :  { %v4195_v24 = vpop.eup %3921 }
 0x2cc   :  { %v4197_v25 = vpop.eup %3923  ;;  %v1346_v27 = vsel %vm655_vm2, %v4195_v24, 0.0 }
 0x2cd   :  { %1347 = vadd.xlane.f32.xlu0 %v1346_v27  ;;  %v1343_v28 = vsel %vm655_vm2, %v4197_v25, 0.0 }
 0x2ce   :  { %1344 = vadd.xlane.f32.xlu1 %v1343_v28 }
 0x2df   :  { %1897 = vrot.lane.b32.xlu1 %v4107_v1, %s3981_s19 }
 0x2e3   :  { %1821 = vrot.lane.b32.xlu0 %v4105_v63, %s3981_s19 }
 0x338   :  { %v1327_v33 = vpop.xlane.xlu1 %1326 }
 0x339   :  { %3925 = vrcp.f32 %v1327_v33 }
 0x33c   :  { %v1330_v34 = vpop.xlane.xlu0 %1329 }
 0x33d   :  { %3927 = vrcp.f32 %v1330_v34  ;;  %v75_v34 = vld [vmem:[#allocation2 + $0x180] sm:$0xff] }
 0x341   :  { %v1333_v35 = vpop.xlane.xlu1 %1332 }
 0x342   :  { %3929 = vrcp.f32 %v1333_v35 }
 0x345   :  { %v1336_v36 = vpop.xlane.xlu0 %1335 }
 0x346   :  { %v3926_v37 = vpop.eup %3925  ;;  %3931 = vrcp.f32 %v1336_v36 }
 0x347   :  { %v1350_v39 = vmul.f32 %v3926_v37, %v3910_v60  ;;  %v68_v60 = vld [vmem:[#allocation2 + $0x148] sm:$0xff] }
 0x349   :  { %3707 = vmatmul.mubr.msk.f32.vlgmr.msra.gmra.mxu0 %vm655_vm2, %v1350_v39 }
 0x34a   :  { %v3928_v1 = vpop.eup %3927  ;;  %3715 = vmatpush3.msra.mxu0 %v1518_v29  ;;  %3716 = vmatprep.mubr.msk.f32.mxu0 %vm3979_vm0, %v3978_v0 }
 0x34b   :  { %v1352_v63 = vmul.f32 %v3928_v1, %v3912_v3  ;;  %3724 = vmatprep.subr.mxu0 %v3978_v0 }
 0x34c   :  { %v1342_v40 = vpop.xlane.xlu0 %1341 }
 0x34d   :  { %3933 = vrcp.f32 %v1342_v40  ;;  %v1339_v42 = vpop.xlane.xlu1 %1338  ;;  %3712 = vmatmul.mubr.msk.f32.vlgmr.msra.gmra.mxu1 %vm655_vm2, %v1352_v63 }
 0x34e   :  { %3935 = vrcp.f32 %v1339_v42  ;;  %3720 = vmatpush3.msra.mxu1 %v1594_v30  ;;  %3721 = vmatprep.mubr.msk.f32.mxu1 %vm3979_vm0, %v3978_v0 }
 0x34f   :  { %v3930_v43 = vpop.eup %3929  ;;  %3729 = vmatprep.subr.mxu1 %v3978_v0 }
 0x350   :  { %v1354_v44 = vmul.f32 %v3930_v43, %v4183_v7  ;;  %v72_v7 = vld [vmem:[#allocation2 + $0x168] sm:$0xff] }
 0x352   :  { %3717 = vmatmul.mubr.msk.f32.vlgmr.msra.gmra.mxu0 %vm655_vm2, %v1354_v44 }
 0x353   :  { %v3932_v45 = vpop.eup %3931  ;;  %3725 = vmatpush3.msra.mxu0 %v1670_v32  ;;  %3726 = vmatprep.mubr.msk.f32.mxu0 %vm3979_vm0, %v3978_v0 }
 0x354   :  { %v1356_v47 = vmul.f32 %v3932_v45, %v4187_v12  ;;  %3734 = vmatprep.subr.mxu0 %v3978_v0 }
 0x356   :  { %v1348_v48 = vpop.xlane.xlu0 %1347  ;;  %3722 = vmatmul.mubr.msk.f32.vlgmr.msra.gmra.mxu1 %vm655_vm2, %v1356_v47 }
 0x357   :  { %3937 = vrcp.f32 %v1348_v48  ;;  %v1345_v50 = vpop.xlane.xlu1 %1344  ;;  %3730 = vmatpush3.msra.mxu1 %v1746_v31  ;;  %3731 = vmatprep.mubr.msk.f32.mxu1 %vm3979_vm0, %v3978_v0 }
 0x358   :  { %3939 = vrcp.f32 %v1345_v50  ;;  %3739 = vmatprep.subr.mxu1 %v3978_v0 }
 0x35a   :  { %v3934_v51 = vpop.eup %3933  ;;  %v1822_v46 = vpop.permute.xlu0 %1821 }
 0x35b   :  { %v3936_v52 = vpop.eup %3935  ;;  %v1360_v53 = vmul.f32 %v3934_v51, %v3918_v20  ;;  %v1898_v54 = vpop.permute.xlu1 %1897 }
 0x35c   :  { %v1358_v38 = vmul.f32 %v3936_v52, %v3920_v21 }
 0x35d   :  { %3732 = vmatmul.mubr.msk.f32.vlgmr.msra.gmra.mxu1 %vm655_vm2, %v1360_v53 }
 0x35e   :  { %3727 = vmatmul.mubr.msk.f32.vlgmr.msra.gmra.mxu0 %vm655_vm2, %v1358_v38  ;;  %3740 = vmatpush3.msra.mxu1 %v1898_v54 }
 0x35f   :  { %3735 = vmatpush3.msra.mxu0 %v1822_v46  ;;  %3736 = vmatprep.mubr.msk.f32.mxu0 %vm3979_vm0, %v3978_v0 }
 0x360   :  { %3741 = vmatprep.mubr.msk.f32.mxu1 %vm3979_vm0, %v3978_v0  ;;  %3744 = vmatprep.subr.mxu0 %v3978_v0 }
 0x361   :  { %3749 = vmatprep.subr.mxu1 %v3978_v0 }
 0x364   :  { %v3938_v57 = vpop.eup %3937 }
 0x365   :  { %v3940_v41 = vpop.eup %3939  ;;  %v1364_v58 = vmul.f32 %v3938_v57, %v4195_v24 }
 0x366   :  { %v1362_v49 = vmul.f32 %v3940_v41, %v4197_v25 }
 0x367   :  { %3742 = vmatmul.mubr.msk.f32.vlgmr.msra.gmra.mxu1 %vm655_vm2, %v1364_v58 }
 0x368   :  { %3737 = vmatmul.mubr.msk.f32.vlgmr.msra.gmra.mxu0 %vm655_vm2, %v1362_v49  ;;  %3751 = vmatprep.mubr.msk.f32.mxu1 %vm3979_vm0, %v3978_v0 }
 0x369   :  { %3746 = vmatprep.mubr.msk.f32.mxu0 %vm3979_vm0, %v3978_v0  ;;  %3745 = vmatpush3.msra.mxu0 %v67_v59 }
 0x36a   :  { %3754 = vmatprep.subr.mxu0 %v3978_v0  ;;  %3750 = vmatpush3.msra.mxu1 %v68_v60 }
 0x36b   :  { %3759 = vmatprep.subr.mxu1 %v3978_v0 }
 0x409   :  { %v1437_v56 = vpop.f32.mrf.mxu0 }
 0x40a   :  { %3747 = vmatmul.mubr.msk.f32.vlgmr.msra.gmra.mxu0 %vm655_vm2, %v1437_v56 }
 0x40b   :  { %v3708_v61 = vpop.f32.mrf.mxu0  ;;  %3755 = vmatpush3.msra.mxu0 %v69_v55  ;;  %3756 = vmatprep.mubr.msk.f32.mxu0 %vm3979_vm0, %v3978_v0 }
 0x40c   :  { %3764 = vmatprep.subr.mxu0 %v3978_v0 }
 0x40d   :  { %v1513_v2 = vpop.f32.mrf.mxu1 }
 0x40e   :  { %3752 = vmatmul.mubr.msk.f32.vlgmr.msra.gmra.mxu1 %vm655_vm2, %v1513_v2 }
 0x40f   :  { %v3713_v3 = vpop.f32.mrf.mxu1  ;;  %3760 = vmatpush3.msra.mxu1 %v70_v62  ;;  %3761 = vmatprep.mubr.msk.f32.mxu1 %vm3979_vm0, %v3978_v0 }
 0x410   :  { %3769 = vmatprep.subr.mxu1 %v3978_v0 }
 0x412   :  { %v1589_v5 = vpop.f32.mrf.mxu0 }
 0x413   :  { %3757 = vmatmul.mubr.msk.f32.vlgmr.msra.gmra.mxu0 %vm655_vm2, %v1589_v5 }
 0x414   :  { %v3718_v6 = vpop.f32.mrf.mxu0  ;;  %3765 = vmatpush3.msra.mxu0 %v71_v4  ;;  %3766 = vmatprep.mubr.msk.f32.mxu0 %vm3979_vm0, %v3978_v0 }
 0x415   :  { %3774 = vmatprep.subr.mxu0 %v3978_v0  ;;  %v2613_v6 = vld [vmem:[#allocation2 + $0x1c8] sm:$0xff] }
 0x416   :  { %v1665_v8 = vpop.f32.mrf.mxu1 }
 0x417   :  { %3762 = vmatmul.mubr.msk.f32.vlgmr.msra.gmra.mxu1 %vm655_vm2, %v1665_v8  ;;  %v2610_v8 = vld [vmem:[#allocation2 + $0x1b0] sm:$0xff] }
 0x418   :  { %v3723_v10 = vpop.f32.mrf.mxu1  ;;  %3770 = vmatpush3.msra.mxu1 %v72_v7  ;;  %3771 = vmatprep.mubr.msk.f32.mxu1 %vm3979_vm0, %v3978_v0  ;;  %v2611_v7 = vld [vmem:[#allocation2 + $0x1b8] sm:$0xff] }
 0x419   :  { %3779 = vmatprep.subr.mxu1 %v3978_v0  ;;  %v2617_v10 = vld [vmem:[#allocation2 + $0x1e8] sm:$0xff] }
 0x41d   :  { %v1817_v12 = vpop.f32.mrf.mxu1 }
 0x41e   :  { %v1741_v14 = vpop.f32.mrf.mxu0  ;;  %3772 = vmatmul.mubr.msk.f32.vlgmr.msra.gmra.mxu1 %vm655_vm2, %v1817_v12  ;;  %v2615_v12 = vld [vmem:[#allocation2 + $0x1d8] sm:$0xff] }
 0x41f   :  { %3767 = vmatmul.mubr.msk.f32.vlgmr.msra.gmra.mxu0 %vm655_vm2, %v1741_v14  ;;  %v3733_v15 = vpop.f32.mrf.mxu1  ;;  %3780 = vmatpush3.msra.mxu1 %v74_v11  ;;  %v2616_v11 = vld [vmem:[#allocation2 + $0x1e0] sm:$0xff] }
 0x420   :  { %v3728_v16 = vpop.f32.mrf.mxu0  ;;  %3775 = vmatpush3.msra.mxu0 %v73_v13  ;;  %3776 = vmatprep.mubr.msk.f32.mxu0 %vm3979_vm0, %v3978_v0  ;;  %v2614_v13 = vld [vmem:[#allocation2 + $0x1d0] sm:$0xff] }
 0x421   :  { %3781 = vmatprep.mubr.msk.f32.mxu1 %vm3979_vm0, %v3978_v0  ;;  %3784 = vmatprep.subr.mxu0 %v3978_v0 }
 0x422   :  { %3795 = vmatprep.subr.mxu1 %v3978_v0 }
 0x427   :  { %v1969_v17 = vpop.f32.mrf.mxu1 }
 0x428   :  { %v1893_v18 = vpop.f32.mrf.mxu0  ;;  %3782 = vmatmul.mubr.msk.f32.vlgmr.msra.gmra.mxu1 %vm655_vm2, %v1969_v17 }
 0x429   :  { %3777 = vmatmul.mubr.msk.f32.vlgmr.msra.gmra.mxu0 %vm655_vm2, %v1893_v18  ;;  %v3743_v19 = vpop.f32.mrf.mxu1  ;;  %3803 = vmatprep.mubr.msk.f32.mxu1 %vm3979_vm0, %v3978_v0  ;;  %v2575_v18 = vld [vmem:[#allocation2 + $0x190] sm:$0xff] }
 0x42a   :  { %v3738_v20 = vpop.f32.mrf.mxu0  ;;  %3792 = vmatprep.mubr.msk.f32.mxu0 %vm3979_vm0, %v3978_v0  ;;  %3785 = vmatpush3.msra.mxu0 %v2613_v6 }
 0x42b   :  { %3786 = vmatprep.subr.mxu0 %v3978_v0  ;;  %3796 = vmatpush3.msra.mxu1 %v2617_v10 }
 0x42c   :  { %3797 = vmatprep.subr.mxu1 %v3978_v0 }
 0x42d   :  { %3798 = vmatpush3.msra.mxu1 %v2616_v11 }
 0x42e   :  { %3799 = vmatprep.subr.mxu1 %v3978_v0 }
 0x42f   :  { %3800 = vmatpush3.msra.mxu1 %v2615_v12 }
 0x430   :  { %3801 = vmatprep.subr.mxu1 %v3978_v0 }
 0x431   :  { %3802 = vmatpush3.msra.mxu1 %v2614_v13 }
 0x432   :  { %3825 = vmatprep.subr.mxu1 %v3978_v0 }
 0x4ca   :  { %v2042_v21 = vpop.f32.mrf.mxu0 }
 0x4cb   :  { %v2557_v28 = vsel %vm77_vm1, %v2042_v21, 0.0  ;;  %v2577_v21 = vld [vmem:[#allocation2 + $0x1a0] sm:$0xff] }
 0x4cc   :  { %v3748_v22 = vpop.f32.mrf.mxu0 }
 0x4ce   :  { %v2115_v23 = vpop.f32.mrf.mxu1 }
 0x4cf   :  { %v2558_v25 = vsel %vm77_vm1, %v2115_v23, 0.0 }
 0x4d0   :  { %v3753_v24 = vpop.f32.mrf.mxu1  ;;  %v2559_v30 = vadd.f32 %v2558_v25, %v2557_v28  ;;  %v2774_v28 = vld [vmem:[#allocation2 + $0x230] sm:$0xff] }
 0x4d3   :  { %v2188_v27 = vpop.f32.mrf.mxu0 }
 0x4d4   :  { %v2560_v29 = vsel %vm77_vm1, %v2188_v27, 0.0  ;;  %v2775_v27 = vld [vmem:[#allocation2 + $0x238] sm:$0xff] }
 0x4d5   :  { %v3758_v31 = vpop.f32.mrf.mxu0  ;;  %v2561_v32 = vadd.f32 %v2560_v29, %v2559_v30  ;;  %v2773_v29 = vld [vmem:[#allocation2 + $0x228] sm:$0xff]  ;;  %v2772_v30 = vld [vmem:[#allocation2 + $0x220] sm:$0xff] }
 0x4d6   :  { %v2771_v31 = vld [vmem:[#allocation2 + $0x218] sm:$0xff] }
 0x4d7   :  { %v2261_v33 = vpop.f32.mrf.mxu1 }
 0x4d8   :  { %v2562_v35 = vsel %vm77_vm1, %v2261_v33, 0.0  ;;  %v2576_v33 = vld [vmem:[#allocation2 + $0x198] sm:$0xff] }
 0x4d9   :  { %v2563_v36 = vadd.f32 %v2562_v35, %v2561_v32  ;;  %v3763_v37 = vpop.f32.mrf.mxu1  ;;  %v2578_v35 = vld [vmem:[#allocation2 + $0x1a8] sm:$0xff] }
 0x4db   :  { %v2571_v39 = vadd.f32 %v2563_v36, %v75_v34 }
 0x4dd   :  { %v2573_v1 = vadd.f32 %v2571_v39, %v4014_v9  ;;  %v76_v9 = vld [vmem:[#allocation2 + $0x188] sm:$0xff]  ;;  %v2770_v39 = vld [vmem:[#allocation2 + $0x210] sm:$0xff] }
 0x4de   :  { %v2407_v63 = vpop.f32.mrf.mxu1 }
 0x4df   :  { %v2334_v40 = vpop.f32.mrf.mxu0  ;;  %v2579_v42 = vsel %vm77_vm1, %v2573_v1, 0.0  ;;  %v2565_v47 = vsel %vm77_vm1, %v2407_v63, 0.0  ;;  %v2783_v63 = vld [vmem:[#allocation2 + $0x278] sm:$0xff] }
 0x4e0   :  { %v3773_v43 = vpop.f32.mrf.mxu1  ;;  %2580 = vadd.xlane.f32.xlu0 %v2579_v42  ;;  %v2564_v45 = vsel %vm77_vm1, %v2334_v40, 0.0  ;;  %v2768_v40 = vld [vmem:[#allocation2 + $0x200] sm:$0xff]  ;;  %v2782_v42 = vld [vmem:[#allocation2 + $0x270] sm:$0xff] }
 0x4e1   :  { %v3768_v44 = vpop.f32.mrf.mxu0  ;;  %v2566_v50 = vadd.f32 %v2565_v47, %v2564_v45  ;;  %v2781_v43 = vld [vmem:[#allocation2 + $0x268] sm:$0xff]  ;;  %v2779_v45 = vld [vmem:[#allocation2 + $0x258] sm:$0xff]  ;;  %v2778_v47 = vld [vmem:[#allocation2 + $0x250] sm:$0xff] }
 0x4e2   :  { %v2780_v44 = vld [vmem:[#allocation2 + $0x260] sm:$0xff] }
 0x4e8   :  { %v2553_v48 = vpop.f32.mrf.mxu1 }
 0x4e9   :  { %v2480_v51 = vpop.f32.mrf.mxu0  ;;  %v2569_v46 = vsel %vm77_vm1, %v2553_v48, 0.0  ;;  %v2777_v48 = vld [vmem:[#allocation2 + $0x248] sm:$0xff] }
 0x4ea   :  { %v2567_v52 = vsel %vm77_vm1, %v2480_v51, 0.0  ;;  %v3783_v53 = vpop.f32.mrf.mxu1  ;;  %v2618_v51 = vld [vmem:[#allocation2 + $0x1f0] sm:$0xff] }
 0x4eb   :  { %v2568_v38 = vadd.f32 %v2567_v52, %v2566_v50  ;;  %v3778_v54 = vpop.f32.mrf.mxu0  ;;  %v2776_v50 = vld [vmem:[#allocation2 + $0x240] sm:$0xff] }
 0x4ed   :  { %v2570_v57 = vadd.f32 %v2569_v46, %v2568_v38 }
 0x4ef   :  { %v2572_v41 = vadd.f32 %v2570_v57, %v76_v9  ;;  %v2619_v9 = vld [vmem:[#allocation2 + $0x1f8] sm:$0xff] }
 0x4f1   :  { %v2574_v58 = vadd.f32 %v2572_v41, %v4049_v26  ;;  %v2612_v26 = vld [vmem:[#allocation2 + $0x1c0] sm:$0xff] }
 0x4f2   :  { %3787 = vmatpush3.msra.mxu0 %v2612_v26 }
 0x4f3   :  { %v2582_v49 = vsel %vm77_vm1, %v2574_v58, 0.0  ;;  %3788 = vmatprep.subr.mxu0 %v3978_v0 }
 0x4f4   :  { %2583 = vadd.xlane.f32.xlu1 %v2582_v49  ;;  %3789 = vmatpush3.msra.mxu0 %v2611_v7  ;;  %v2784_v49 = vld [vmem:[#allocation2 + $0x280] sm:$0xff] }
 0x4f5   :  { %3790 = vmatprep.subr.mxu0 %v3978_v0 }
 0x4f6   :  { %3791 = vmatpush3.msra.mxu0 %v2610_v8 }
 0x4f7   :  { %3806 = vmatprep.subr.mxu0 %v3978_v0 }
 0x569   :  { %v2581_v59 = vpop.xlane.xlu0 %2580 }
 0x56a   :  { %v2586_v60 = vmul.f32 0.03125, %v2581_v59 }
 0x56c   :  { %v2588_v55 = vsub.f32 %v2573_v1, %v2586_v60  ;;  %v2769_v1 = vld [vmem:[#allocation2 + $0x208] sm:$0xff] }
 0x56e   :  { %v2590_v56 = vmul.f32 %v2588_v55, %v2588_v55 }
 0x570   :  { %v2592_v61 = vsel %vm77_vm1, %v2590_v56, 0.0 }
 0x571   :  { %2593 = vadd.xlane.f32.xlu0 %v2592_v61 }
 0x57d   :  { %v2584_v62 = vpop.xlane.xlu1 %2583 }
 0x57e   :  { %v2587_v2 = vmul.f32 0.03125, %v2584_v62  ;;  %v2785_v62 = vld [vmem:[#allocation2 + $0x288] sm:$0xff] }
 0x580   :  { %v2589_v3 = vsub.f32 %v2574_v58, %v2587_v2 }
 0x582   :  { %v2591_v4 = vmul.f32 %v2589_v3, %v2589_v3 }
 0x584   :  { %v2595_v5 = vsel %vm77_vm1, %v2591_v4, 0.0 }
 0x585   :  { %2596 = vadd.xlane.f32.xlu0 %v2595_v5 }
 0x5fa   :  { %v2594_v14 = vpop.xlane.xlu0 %2593 }
 0x5fb   :  { %v2598_v15 = vmul.f32 0.03125, %v2594_v14 }
 0x5fd   :  { %v2600_v16 = vadd.f32 1e-05, %v2598_v15 }
 0x5ff   :  { %3941 = vrsqrt.f32 %v2600_v16 }
 0x60c   :  { %v3942_v17 = vpop.eup %3941 }
 0x60d   :  { %v2604_v19 = vmul.f32 %v3942_v17, %v2588_v55  ;;  %v2972_v17 = vld [vmem:[#allocation2 + $0x2c8] sm:$0xff] }
 0x60e   :  { %v2597_v20 = vpop.xlane.xlu0 %2596 }
 0x60f   :  { %v2599_v22 = vmul.f32 0.03125, %v2597_v20  ;;  %v2606_v23 = vmul.f32 %v2604_v19, %v2575_v18  ;;  %v2971_v18 = vld [vmem:[#allocation2 + $0x2c0] sm:$0xff]  ;;  %v2970_v19 = vld [vmem:[#allocation2 + $0x2b8] sm:$0xff]  ;;  %v2969_v20 = vld [vmem:[#allocation2 + $0x2b0] sm:$0xff] }
 0x611   :  { %v2601_v24 = vadd.f32 1e-05, %v2599_v22  ;;  %v4295_v25 = vadd.f32 %v2606_v23, %v2577_v21  ;;  %v2976_v21 = vld [vmem:[#allocation2 + $0x2e8] sm:$0xff]  ;;  %v2975_v22 = vld [vmem:[#allocation2 + $0x2e0] sm:$0xff]  ;;  %v2974_v23 = vld [vmem:[#allocation2 + $0x2d8] sm:$0xff] }
 0x613   :  { %3943 = vrsqrt.f32 %v2601_v24  ;;  %3793 = vmatmul.mubr.msk.f32.vlgmr.msra.gmra.mxu0 %vm77_vm1, %v4295_v25  ;;  %v2973_v24 = vld [vmem:[#allocation2 + $0x2d0] sm:$0xff] }
 0x614   :  { %3807 = vmatpush3.msra.mxu0 %v2775_v27  ;;  %3822 = vmatprep.mubr.msk.f32.mxu0 %vm3979_vm0, %v3978_v0 }
 0x615   :  { %3808 = vmatprep.subr.mxu0 %v3978_v0 }
 0x616   :  { %3809 = vmatpush3.msra.mxu0 %v2774_v28 }
 0x617   :  { %3810 = vmatprep.subr.mxu0 %v3978_v0 }
 0x618   :  { %3811 = vmatpush3.msra.mxu0 %v2773_v29 }
 0x619   :  { %3812 = vmatprep.subr.mxu0 %v3978_v0 }
 0x61a   :  { %3813 = vmatpush3.msra.mxu0 %v2772_v30  ;;  %v2935_v30 = vld [vmem:[#allocation2 + $0x290] sm:$0xff] }
 0x61b   :  { %3814 = vmatprep.subr.mxu0 %v3978_v0 }
 0x61c   :  { %3815 = vmatpush3.msra.mxu0 %v2771_v31 }
 0x61d   :  { %3816 = vmatprep.subr.mxu0 %v3978_v0 }
 0x61e   :  { %3817 = vmatpush3.msra.mxu0 %v2770_v39 }
 0x61f   :  { %3818 = vmatprep.subr.mxu0 %v3978_v0 }
 0x620   :  { %v3944_v32 = vpop.eup %3943  ;;  %3819 = vmatpush3.msra.mxu0 %v2769_v1  ;;  %v2936_v1 = vld [vmem:[#allocation2 + $0x298] sm:$0xff] }
 0x621   :  { %v2605_v34 = vmul.f32 %v3944_v32, %v2589_v3  ;;  %3820 = vmatprep.subr.mxu0 %v3978_v0 }
 0x622   :  { %3821 = vmatpush3.msra.mxu0 %v2768_v40  ;;  %v2938_v40 = vld [vmem:[#allocation2 + $0x2a8] sm:$0xff] }
 0x623   :  { %v2607_v36 = vmul.f32 %v2605_v34, %v2576_v33  ;;  %3844 = vmatprep.subr.mxu0 %v3978_v0  ;;  %v2937_v33 = vld [vmem:[#allocation2 + $0x2a0] sm:$0xff] }
 0x625   :  { %v2609_v37 = vadd.f32 %v2607_v36, %v2578_v35 }
 0x627   :  { %3804 = vmatmul.mubr.msk.f32.vlgmr.msra.gmra.mxu1 %vm77_vm1, %v2609_v37 }
 0x628   :  { %3841 = vmatprep.mubr.msk.f32.mxu1 %vm3979_vm0, %v3978_v0  ;;  %3826 = vmatpush3.msra.mxu1 %v2783_v63 }
 0x629   :  { %3827 = vmatprep.subr.mxu1 %v3978_v0 }
 0x62a   :  { %3828 = vmatpush3.msra.mxu1 %v2782_v42 }
 0x62b   :  { %3829 = vmatprep.subr.mxu1 %v3978_v0 }
 0x62c   :  { %3830 = vmatpush3.msra.mxu1 %v2781_v43 }
 0x62d   :  { %3831 = vmatprep.subr.mxu1 %v3978_v0 }
 0x62e   :  { %3832 = vmatpush3.msra.mxu1 %v2780_v44  ;;  %v3128_v44 = vld [vmem:[#allocation2 + $0x318] sm:$0xff] }
 0x62f   :  { %3833 = vmatprep.subr.mxu1 %v3978_v0 }
 0x630   :  { %3834 = vmatpush3.msra.mxu1 %v2779_v45  ;;  %v3127_v45 = vld [vmem:[#allocation2 + $0x310] sm:$0xff] }
 0x631   :  { %3835 = vmatprep.subr.mxu1 %v3978_v0 }
 0x632   :  { %3836 = vmatpush3.msra.mxu1 %v2778_v47  ;;  %v3126_v47 = vld [vmem:[#allocation2 + $0x308] sm:$0xff] }
 0x633   :  { %3837 = vmatprep.subr.mxu1 %v3978_v0 }
 0x634   :  { %3838 = vmatpush3.msra.mxu1 %v2777_v48  ;;  %v3125_v48 = vld [vmem:[#allocation2 + $0x300] sm:$0xff] }
 0x635   :  { %3839 = vmatprep.subr.mxu1 %v3978_v0 }
 0x636   :  { %3840 = vmatpush3.msra.mxu1 %v2776_v50  ;;  %v3132_v50 = vld [vmem:[#allocation2 + $0x338] sm:$0xff] }
 0x637   :  { %3855 = vmatprep.subr.mxu1 %v3978_v0 }
 0x6d3   :  { %v2689_v52 = vpop.f32.mrf.mxu0 }
 0x6d4   :  { %v2690_v53 = vadd.f32 %v2689_v52, %v2618_v51  ;;  %v3131_v51 = vld [vmem:[#allocation2 + $0x330] sm:$0xff]  ;;  %v3130_v52 = vld [vmem:[#allocation2 + $0x328] sm:$0xff] }
 0x6d5   :  { %v3794_v38 = vpop.f32.mrf.mxu0 }
 0x6d6   :  { %v2766_v54 = vmax.f32 %v2690_v53, 0.0  ;;  %v3129_v53 = vld [vmem:[#allocation2 + $0x320] sm:$0xff]  ;;  %v2977_v38 = vld [vmem:[#allocation2 + $0x2f0] sm:$0xff] }
 0x6d8   :  { %3823 = vmatmul.mubr.msk.f32.vlgmr.msra.gmra.mxu0 %vm2786_vm3, %v2766_v54 }
 0x6d9   :  { %3852 = vmatprep.mubr.msk.f32.mxu0 %vm3979_vm0, %v3978_v0  ;;  %3845 = vmatpush3.msra.mxu0 %v2972_v17 }
 0x6da   :  { %3846 = vmatprep.subr.mxu0 %v3978_v0 }
 0x6db   :  { %3847 = vmatpush3.msra.mxu0 %v2971_v18  ;;  %v3305_v18 = vld [vmem:[#allocation2 + $0x368] sm:$0xff] }
 0x6dc   :  { %3848 = vmatprep.subr.mxu0 %v3978_v0 }
 0x6dd   :  { %3849 = vmatpush3.msra.mxu0 %v2970_v19 }
 0x6de   :  { %3850 = vmatprep.subr.mxu0 %v3978_v0 }
 0x6df   :  { %3851 = vmatpush3.msra.mxu0 %v2969_v20 }
 0x6e0   :  { %3866 = vmatprep.subr.mxu0 %v3978_v0 }
 0x6e7   :  { %v2762_v46 = vpop.f32.mrf.mxu1 }
 0x6e8   :  { %v2763_v57 = vadd.f32 %v2762_v46, %v2619_v9 }
 0x6e9   :  { %v3805_v41 = vpop.f32.mrf.mxu1 }
 0x6ea   :  { %v2767_v58 = vmax.f32 %v2763_v57, 0.0  ;;  %v2978_v57 = vld [vmem:[#allocation2 + $0x2f8] sm:$0xff] }
 0x6ec   :  { %3842 = vmatmul.mubr.msk.f32.vlgmr.msra.gmra.mxu1 %vm2786_vm3, %v2767_v58 }
 0x6ed   :  { %3863 = vmatprep.mubr.msk.f32.mxu1 %vm3979_vm0, %v3978_v0  ;;  %3856 = vmatpush3.msra.mxu1 %v2976_v21 }
 0x6ee   :  { %3857 = vmatprep.subr.mxu1 %v3978_v0 }
 0x6ef   :  { %3858 = vmatpush3.msra.mxu1 %v2975_v22 }
 0x6f0   :  { %3859 = vmatprep.subr.mxu1 %v3978_v0 }
 0x6f1   :  { %3860 = vmatpush3.msra.mxu1 %v2974_v23 }
 0x6f2   :  { %3861 = vmatprep.subr.mxu1 %v3978_v0 }
 0x6f3   :  { %3862 = vmatpush3.msra.mxu1 %v2973_v24 }
 0x6f4   :  { %3877 = vmatprep.subr.mxu1 %v3978_v0 }
 0x798   :  { %v2856_v59 = vpop.f32.mrf.mxu0 }
 0x799   :  { %v2857_v60 = vadd.f32 %v2856_v59, %v2784_v49  ;;  %v3982_v59 = vmov 0  }
 0x79a   :  { %v3824_v55 = vpop.f32.mrf.mxu0  ;;  %3907 = vset.pattern.permute.xlu1 %v3982_v59  ;;  %3908 = vset.pattern.permute.xlu0 %v3982_v59 }
 0x79b   :  { %v2933_v56 = vadd.f32 %v2857_v60, %v4295_v25  ;;  %v3304_v60 = vld [vmem:[#allocation2 + $0x360] sm:$0xff] }
 0x79d   :  { %v2939_v61 = vsel %vm77_vm1, %v2933_v56, 0.0 }
 0x79e   :  { %2940 = vadd.xlane.f32.xlu1 %v2939_v61 }
 0x7ac   :  { %v2929_v2 = vpop.f32.mrf.mxu1 }
 0x7ad   :  { %v2930_v3 = vadd.f32 %v2929_v2, %v2785_v62  ;;  %v3279_v62 = vld [vmem:[#allocation2 + $0x340] sm:$0xff] }
 0x7ae   :  { %v3843_v4 = vpop.f32.mrf.mxu1 }
 0x7af   :  { %v2934_v5 = vadd.f32 %v2930_v3, %v2609_v37 }
 0x7b1   :  { %v2942_v6 = vsel %vm77_vm1, %v2934_v5, 0.0 }
 0x7b2   :  { %2943 = vadd.xlane.f32.xlu0 %v2942_v6 }
 0x827   :  { %v2941_v26 = vpop.xlane.xlu1 %2940 }
 0x828   :  { %v2945_v7 = vmul.f32 0.03125, %v2941_v26 }
 0x82a   :  { %v2947_v8 = vsub.f32 %v2933_v56, %v2945_v7  ;;  %v3303_v7 = vld [vmem:[#allocation2 + $0x358] sm:$0xff] }
 0x82c   :  { %v2949_v10 = vmul.f32 %v2947_v8, %v2947_v8 }
 0x82e   :  { %v2951_v11 = vsel %vm77_vm1, %v2949_v10, 0.0 }
 0x82f   :  { %2952 = vadd.xlane.f32.xlu1 %v2951_v11 }
 0x83b   :  { %v2944_v12 = vpop.xlane.xlu0 %2943 }
 0x83c   :  { %v2946_v13 = vmul.f32 0.03125, %v2944_v12  ;;  %v3301_v12 = vld [vmem:[#allocation2 + $0x348] sm:$0xff] }
 0x83e   :  { %v2948_v14 = vsub.f32 %v2934_v5, %v2946_v13 }
 0x840   :  { %v2950_v15 = vmul.f32 %v2948_v14, %v2948_v14 }
 0x842   :  { %v2954_v16 = vsel %vm77_vm1, %v2950_v15, 0.0 }
 0x843   :  { %2955 = vadd.xlane.f32.xlu0 %v2954_v16 }
 0x8b8   :  { %v2953_v25 = vpop.xlane.xlu1 %2952 }
 0x8b9   :  { %v2957_v27 = vmul.f32 0.03125, %v2953_v25 }
 0x8bb   :  { %v2959_v28 = vadd.f32 1e-05, %v2957_v27 }
 0x8bd   :  { %3945 = vrsqrt.f32 %v2959_v28 }
 0x8ca   :  { %v3946_v29 = vpop.eup %3945 }
 0x8cb   :  { %v2963_v31 = vmul.f32 %v3946_v29, %v2947_v8  ;;  %v3302_v8 = vld [vmem:[#allocation2 + $0x350] sm:$0xff] }
 0x8cc   :  { %v2956_v32 = vpop.xlane.xlu0 %2955 }
 0x8cd   :  { %v2958_v34 = vmul.f32 0.03125, %v2956_v32  ;;  %v2965_v35 = vmul.f32 %v2963_v31, %v2935_v30 }
 0x8cf   :  { %v2960_v36 = vadd.f32 1e-05, %v2958_v34  ;;  %v2967_v37 = vadd.f32 %v2965_v35, %v2937_v33 }
 0x8d1   :  { %3947 = vrsqrt.f32 %v2960_v36  ;;  %3853 = vmatmul.mubr.msk.f32.vlgmr.msra.gmra.mxu0 %vm77_vm1, %v2967_v37 }
 0x8d2   :  { %3874 = vmatprep.mubr.msk.f32.mxu0 %vm3979_vm0, %v3978_v0  ;;  %3867 = vmatpush3.msra.mxu0 %v3132_v50 }
 0x8d3   :  { %3868 = vmatprep.subr.mxu0 %v3978_v0 }
 0x8d4   :  { %3869 = vmatpush3.msra.mxu0 %v3131_v51 }
 0x8d5   :  { %3870 = vmatprep.subr.mxu0 %v3978_v0 }
 0x8d6   :  { %3871 = vmatpush3.msra.mxu0 %v3130_v52 }
 0x8d7   :  { %3872 = vmatprep.subr.mxu0 %v3978_v0 }
 0x8d8   :  { %3873 = vmatpush3.msra.mxu0 %v3129_v53 }
 0x8d9   :  { %3888 = vmatprep.subr.mxu0 %v3978_v0 }
 0x8de   :  { %v3948_v39 = vpop.eup %3947 }
 0x8df   :  { %v2964_v63 = vmul.f32 %v3948_v39, %v2948_v14 }
 0x8e1   :  { %v2966_v42 = vmul.f32 %v2964_v63, %v2936_v1 }
 0x8e3   :  { %v2968_v43 = vadd.f32 %v2966_v42, %v2938_v40 }
 0x8e5   :  { %3864 = vmatmul.mubr.msk.f32.vlgmr.msra.gmra.mxu1 %vm77_vm1, %v2968_v43 }
 0x8e6   :  { %3878 = vmatpush3.msra.mxu1 %v3128_v44  ;;  %3885 = vmatprep.mubr.msk.f32.mxu1 %vm3979_vm0, %v3978_v0 }
 0x8e7   :  { %3879 = vmatprep.subr.mxu1 %v3978_v0 }
 0x8e8   :  { %3880 = vmatpush3.msra.mxu1 %v3127_v45 }
 0x8e9   :  { %3881 = vmatprep.subr.mxu1 %v3978_v0 }
 0x8ea   :  { %3882 = vmatpush3.msra.mxu1 %v3126_v47 }
 0x8eb   :  { %3883 = vmatprep.subr.mxu1 %v3978_v0 }
 0x8ec   :  { %3884 = vmatpush3.msra.mxu1 %v3125_v48 }
 0x991   :  { %v3048_v54 = vpop.f32.mrf.mxu0 }
 0x992   :  { %v3049_v9 = vadd.f32 %v3048_v54, %v2977_v38 }
 0x993   :  { %v3854_v46 = vpop.f32.mrf.mxu0 }
 0x994   :  { %3886 = vmatmul.mubr.msk.f32.vlgmr.msra.gmra.mxu1 %vm77_vm1, %v3049_v9 }
 0x9a5   :  { %v3121_v41 = vpop.f32.mrf.mxu1 }
 0x9a6   :  { %v3122_v58 = vadd.f32 %v3121_v41, %v2978_v57 }
 0x9a7   :  { %v3865_v49 = vpop.f32.mrf.mxu1 }
 0x9a8   :  { %3875 = vmatmul.mubr.msk.f32.vlgmr.msra.gmra.mxu0 %vm77_vm1, %v3122_v58 }
 0x9a9   :  { %3896 = vmatprep.mubr.msk.f32.mxu0 %vm3979_vm0, %v3978_v0  ;;  %3889 = vmatpush3.msra.mxu0 %v3304_v60 }
 0x9aa   :  { %3890 = vmatprep.subr.mxu0 %v3978_v0 }
 0x9ab   :  { %3891 = vmatpush3.msra.mxu0 %v3303_v7 }
 0x9ac   :  { %3892 = vmatprep.subr.mxu0 %v3978_v0 }
 0x9ad   :  { %3893 = vmatpush3.msra.mxu0 %v3302_v8 }
 0x9ae   :  { %3894 = vmatprep.subr.mxu0 %v3978_v0 }
 0x9af   :  { %3895 = vmatpush3.msra.mxu0 %v3301_v12 }
 0xa54   :  { %v3275_v55 = vpop.f32.mrf.mxu1 }
 0xa56   :  { %v3887_v56 = vpop.f32.mrf.mxu1 }
 0xa68   :  { %v3202_v61 = vpop.f32.mrf.mxu0 }
 0xa69   :  { %v3276_v2 = vadd.f32 %v3275_v55, %v3202_v61 }
 0xa6a   :  { %v3876_v3 = vpop.f32.mrf.mxu0 }
 0xa6b   :  { %v3280_v4 = vadd.f32 %v3279_v62, %v3276_v2 }
 0xa6d   :  { %v3433_v5 = vmul.f32 -1.442695, %v3280_v4 }
 0xa6f   :  { %3949 = vpow2.f32 %v3433_v5 }
 0xa7c   :  { %v3950_v6 = vpop.eup %3949 }
 0xa7d   :  { %v3284_v26 = vadd.f32 1.0, %v3950_v6 }
 0xa7f   :  { %3951 = vrcp.f32 %v3284_v26 }
 0xa8c   :  { %v3952_v10 = vpop.eup %3951 }
 0xa8d   :  { %3289 = vperm.xlu1 %3907, %v3952_v10   ;;  %v3293_v11 = vsub.f32 1.0, %v3952_v10 }
 0xa8f   :  { %3296 = vperm.xlu0 %3908, %v3293_v11  }
 0xb08   :  { %v3290_v13 = vpop.permute.xlu1 %3289 }
 0xb09   :  { %v3292_v15 = vmul.f32 %v3290_v13, %v3049_v9 }
 0xb0a   :  { %v3297_v14 = vpop.permute.xlu0 %3296 }
 0xb0b   :  { %v3299_v16 = vmul.f32 %v3297_v14, %v3122_v58 }
 0xb0d   :  { %v3300_v17 = vadd.f32 %v3299_v16, %v3292_v15 }
 0xb0f   :  { %3897 = vmatmul.mubr.msk.f32.vlgmr.msra.gmra.mxu0 %vm77_vm1, %v3300_v17 }
 0xbcf   :  { %v3375_v19 = vpop.f32.mrf.mxu0 }
 0xbd0   :  { %v3376_v20 = vadd.f32 %v3375_v19, %v3305_v18 }
 0xbd1   :  { %v3898_v21 = vpop.f32.mrf.mxu0 }
 0xbd2   :  { %3379 = vst [vmem:[%s4363_s2] sm:$0xff] %v3376_v20 }
 0xbd3   :  { %3384 = vsyncpa [#allocation3], 1 }

</bundles_post_ra>
